<compile_context>
chip_gen: v7x
topology: tpu7x:2x2x1
jax: 0.10.0
libtpu: 0.0.40
codegen_flags: <defaults>
</compile_context>

<pallas_src>
import jax
import jax.numpy as jnp
from jax.experimental import pallas as pl
from jax.experimental.pallas import tpu as pltpu


def _round_up(n, m):
    return ((n + m - 1) // m) * m


def _cap_tile_for_vmem(tb, D, compute_dtype, out_dtype, budget_bytes=24 << 20):
    """Guardrail: keep per-step VMEM well under v7x's 32 MiB scoped default."""
    in_bpe = jnp.dtype(compute_dtype).itemsize
    out_bpe = jnp.dtype(out_dtype).itemsize

    def per_step_bytes(t):
        io = 2 * D * t * (in_bpe + out_bpe)      # double-buffered x + out tiles
        interm = 3 * 64 * t * 4                  # a few [<=64, tb] f32 intermediates
        return io + interm

    while tb > 128 and per_step_bytes(tb) > budget_bytes:
        tb -= 128
    return tb


def autoencoder_kernel(x_ref,
                       w1, b1, w2, b2, w3, b3,   # encoder
                       w4, b4, w5, b5, w6, b6,   # decoder
                       out_ref):
    def dense(h, w_ref, b_ref, relu):
        # [out, in] @ [in, tb] on the MXU with f32 accumulation (N = batch tile,
        # lane-dense).  Bias-add / ReLU run in the biases' dtype (bf16 on
        # v6e/v7x; f32 if the caller requested it).  Bias is [out, 1] and
        # broadcasts along the lane/batch axis.
        acc = jnp.dot(w_ref[...], h.astype(w_ref.dtype),
                      preferred_element_type=jnp.float32)
        y = acc.astype(b_ref.dtype) + b_ref[...]
        return jnp.maximum(y, 0.0) if relu else y

    h = x_ref[...]                        # [D, tb], batch on lanes
    # encoder: Linear -> ReLU -> (Dropout=id) -> Linear -> ReLU -> (Dropout=id) -> Linear
    h = dense(h, w1, b1, True)
    h = dense(h, w2, b2, True)
    h = dense(h, w3, b3, False)           # latent (15 zero-padded to 16)
    # decoder: Linear -> ReLU -> (Dropout=id) -> Linear -> ReLU -> (Dropout=id) -> Linear
    h = dense(h, w4, b4, True)
    h = dense(h, w5, b5, True)
    h = dense(h, w6, b6, False)           # reconstruction
    out_ref[...] = h.astype(out_ref.dtype)


def make_params(input_dim, latent_dim=15, key=None):
    """Deterministic synthetic parameters in PyTorch-native [out, in] layout.

    Biases are [out, 1] column vectors (they broadcast over the batch/lane axis
    in the [features, batch] kernel layout).  The latent dim is zero-padded
    15 -> 16; the padded w3/b3 rows and w4 columns are exactly zero, so the
    forward pass is numerically identical to the unpadded module.
    """
    if key is None:
        key = jax.random.PRNGKey(42)
    latent_pad = _round_up(latent_dim, 8)
    dims = [(input_dim, 64), (64, 32), (32, latent_dim),       # encoder
            (latent_dim, 32), (32, 64), (64, input_dim)]       # decoder
    params = []
    for din, dout in dims:
        key, kw, kb = jax.random.split(key, 3)
        scale = float(din) ** -0.5
        w = jax.random.uniform(kw, (dout, din), jnp.float32, -scale, scale)
        b = jax.random.uniform(kb, (dout, 1), jnp.float32, -scale, scale)
        if dout == latent_dim:                      # pad latent output side
            w = jnp.pad(w, ((0, latent_pad - latent_dim), (0, 0)))
            b = jnp.pad(b, ((0, latent_pad - latent_dim), (0, 0)))
        if din == latent_dim:                       # pad latent input side
            w = jnp.pad(w, ((0, 0), (0, latent_pad - latent_dim)))
        params += [w, b]
    return params


def anomaly_detector_forward(x, params, *, batch_tile=2048,
                             compute_dtype=jnp.bfloat16,
                             elementwise_dtype=None, out_dtype=None):
    B, D = x.shape
    out_dtype = x.dtype if out_dtype is None else out_dtype
    ew_dtype = compute_dtype if elementwise_dtype is None else elementwise_dtype

    # --- batch tile (lane-axis) selection ------------------------------------
    # The batch lives on the lane axis, so the tile must be a multiple of 128.
    # Bigger tiles amortize ~0.35 us/grid-step overhead and fill MXU N; the
    # VMEM cap only bites if batch_tile is raised far beyond the default.
    tb = min(_round_up(int(batch_tile), 128), _round_up(B, 128))
    tb = _cap_tile_for_vmem(tb, D, compute_dtype, out_dtype)
    B_pad = _round_up(B, tb)
    n_steps = B_pad // tb
    if n_steps > 1 and n_steps % 2 == 1:
        # Keep the step count even so v7x's two TensorCores get equal work.
        tb = _round_up(pl.cdiv(B, n_steps + 1), 128)
        B_pad = _round_up(B, tb)
        n_steps = B_pad // tb

    # --- batch-on-lanes plumbing ----------------------------------------------
    x_t = jnp.pad(x.astype(compute_dtype), ((0, B_pad - B), (0, 0))).T   # [D, B_pad]
    kernel_params = [p.astype(compute_dtype) if i % 2 == 0 else p.astype(ew_dtype)
                     for i, p in enumerate(params)]

    # --- specs ----------------------------------------------------------------
    x_spec = pl.BlockSpec((D, tb), lambda i: (0, i))
    out_spec = pl.BlockSpec((D, tb), lambda i: (0, i))
    # Constant-index weight/bias blocks (a few KB each): fetched once by the
    # pipeliner.  (pipeline_mode=pl.Buffered(1) would drop the redundant second
    # buffer — negligible here.)
    param_specs = [pl.BlockSpec(p.shape, lambda i: (0, 0)) for p in kernel_params]

    # --- advisory cost estimate -------------------------------------------------
    flops = 2 * B_pad * sum(int(w.shape[0]) * int(w.shape[1])
                            for w in kernel_params[0::2])
    bytes_accessed = (
        int(x_t.size) * jnp.dtype(compute_dtype).itemsize
        + B_pad * D * jnp.dtype(out_dtype).itemsize
        + sum(int(p.size) * jnp.dtype(p.dtype).itemsize for p in kernel_params))
    cost = pl.CostEstimate(flops=flops, transcendentals=0,
                           bytes_accessed=bytes_accessed)

    out_t = pl.pallas_call(
        autoencoder_kernel,
        out_shape=jax.ShapeDtypeStruct((D, B_pad), out_dtype),
        grid_spec=pl.GridSpec(
            grid=(n_steps,),
            in_specs=[x_spec] + param_specs,
            out_specs=out_spec,
        ),
        compiler_params=pltpu.CompilerParams(
            dimension_semantics=("parallel",),
        ),
        cost_estimate=cost,
    )(x_t, *kernel_params)

    out = out_t.T                                   # [B_pad, D]
    return out[:B] if B_pad != B else out


def reference_forward(x, params):
    """Pure-JAX f32 reference mirroring the PyTorch module (eval mode)."""
    w1, b1, w2, b2, w3, b3, w4, b4, w5, b5, w6, b6 = params
    lin = lambda h, w, b: h @ w.T + b.T
    h = jnp.maximum(lin(x, w1, b1), 0.0)
    h = jnp.maximum(lin(h, w2, b2), 0.0)
    h = lin(h, w3, b3)
    h = jnp.maximum(lin(h, w4, b4), 0.0)
    h = jnp.maximum(lin(h, w5, b5), 0.0)
    return lin(h, w6, b6)


if __name__ == "__main__":
    input_dim = 32
    latent_dim = 15

    key = jax.random.PRNGKey(0)
    params = make_params(input_dim, latent_dim)

    # batch=1000: not a multiple of 128 -> exercises the pad/slice path.
    x = jax.random.normal(key, (1000, input_dim), dtype=jnp.float32)
    ref = reference_forward(x, params)

    # Default path: bf16 MXU inputs + bf16 elementwise, f32 accumulation.
    out = anomaly_detector_forward(x, params)
    out = jax.block_until_ready(out)
    assert out.shape == x.shape
    assert jnp.allclose(out, ref, atol=5e-2, rtol=5e-2)

    # Full f32 compute path: tighter tolerance sanity check.
    out_f32 = anomaly_detector_forward(x, params, compute_dtype=jnp.float32)
    out_f32 = jax.block_until_ready(out_f32)
    assert jnp.allclose(out_f32, ref, atol=1e-2, rtol=1e-2)

    # Tiny batch (< 128) exercises the heavily-padded single-step path.
    x_small = jax.random.normal(jax.random.PRNGKey(1), (100, input_dim), jnp.float32)
    out_small = jax.block_until_ready(anomaly_detector_forward(x_small, params))
    assert out_small.shape == x_small.shape
    assert jnp.allclose(out_small, reference_forward(x_small, params),
                        atol=5e-2, rtol=5e-2)

    print("KERNEL_OK")
</pallas_src>

<mosaic_0001>
module attributes {stable_mosaic.version = 11 : i64} {
  func.func @autoencoder_kernel(%arg0: i32, %arg1: memref<32x1024xbf16, #tpu.memory_space<vmem>>, %arg2: memref<64x32xbf16, #tpu.memory_space<vmem>>, %arg3: memref<64x1xbf16, #tpu.memory_space<vmem>>, %arg4: memref<32x64xbf16, #tpu.memory_space<vmem>>, %arg5: memref<32x1xbf16, #tpu.memory_space<vmem>>, %arg6: memref<16x32xbf16, #tpu.memory_space<vmem>>, %arg7: memref<16x1xbf16, #tpu.memory_space<vmem>>, %arg8: memref<32x16xbf16, #tpu.memory_space<vmem>>, %arg9: memref<32x1xbf16, #tpu.memory_space<vmem>>, %arg10: memref<64x32xbf16, #tpu.memory_space<vmem>>, %arg11: memref<64x1xbf16, #tpu.memory_space<vmem>>, %arg12: memref<32x64xbf16, #tpu.memory_space<vmem>>, %arg13: memref<32x1xbf16, #tpu.memory_space<vmem>>, %arg14: memref<32x1024xf32, #tpu.memory_space<vmem>>) attributes {dimension_semantics = [#tpu.dimension_semantics<parallel>], iteration_bounds = array<i64: 1>, scalar_prefetch = 0 : i64, scratch_operands = 0 : i64, tpu.core_type = #tpu.core_type<tc>, window_params = [{transform_indices = @transform_0, window_bounds = array<i64: 32, 1024>}, {pipeline_mode = #tpu.pipeline_mode<synchronous>, transform_indices = @transform_1, window_bounds = array<i64: 64, 32>}, {pipeline_mode = #tpu.pipeline_mode<synchronous>, transform_indices = @transform_2, window_bounds = array<i64: 64, 1>}, {pipeline_mode = #tpu.pipeline_mode<synchronous>, transform_indices = @transform_3, window_bounds = array<i64: 32, 64>}, {pipeline_mode = #tpu.pipeline_mode<synchronous>, transform_indices = @transform_4, window_bounds = array<i64: 32, 1>}, {pipeline_mode = #tpu.pipeline_mode<synchronous>, transform_indices = @transform_5, window_bounds = array<i64: 16, 32>}, {pipeline_mode = #tpu.pipeline_mode<synchronous>, transform_indices = @transform_6, window_bounds = array<i64: 16, 1>}, {pipeline_mode = #tpu.pipeline_mode<synchronous>, transform_indices = @transform_7, window_bounds = array<i64: 32, 16>}, {pipeline_mode = #tpu.pipeline_mode<synchronous>, transform_indices = @transform_8, window_bounds = array<i64: 32, 1>}, {pipeline_mode = #tpu.pipeline_mode<synchronous>, transform_indices = @transform_9, window_bounds = array<i64: 64, 32>}, {pipeline_mode = #tpu.pipeline_mode<synchronous>, transform_indices = @transform_10, window_bounds = array<i64: 64, 1>}, {pipeline_mode = #tpu.pipeline_mode<synchronous>, transform_indices = @transform_11, window_bounds = array<i64: 32, 64>}, {pipeline_mode = #tpu.pipeline_mode<synchronous>, transform_indices = @transform_12, window_bounds = array<i64: 32, 1>}, {transform_indices = @transform_13, window_bounds = array<i64: 32, 1024>}]} {
    %c0 = arith.constant 0 : index
    %c0_0 = arith.constant 0 : index
    %0 = vector.load %arg1[%c0, %c0_0] : memref<32x1024xbf16, #tpu.memory_space<vmem>>, vector<32x1024xbf16>
    %c0_1 = arith.constant 0 : index
    %c0_2 = arith.constant 0 : index
    %1 = vector.load %arg2[%c0_1, %c0_2] : memref<64x32xbf16, #tpu.memory_space<vmem>>, vector<64x32xbf16>
    %cst = arith.constant dense<0.000000e+00> : vector<64x1024xf32>
    %2 = tpu.matmul %1, %0, %cst {dimension_numbers = #tpu.dot_dimension_numbers<[1], [0], [0], [1], [0, 0, 1, 1], [], []>} : vector<64x32xbf16>, vector<32x1024xbf16>, vector<64x1024xf32> -> vector<64x1024xf32>
    %3 = arith.truncf %2 : vector<64x1024xf32> to vector<64x1024xbf16>
    %c0_3 = arith.constant 0 : index
    %c0_4 = arith.constant 0 : index
    %4 = vector.load %arg3[%c0_3, %c0_4] : memref<64x1xbf16, #tpu.memory_space<vmem>>, vector<64x1xbf16>
    %5 = vector.broadcast %4 : vector<64x1xbf16> to vector<64x1024xbf16>
    %6 = arith.addf %3, %5 : vector<64x1024xbf16>
    %cst_5 = arith.constant 0.000000e+00 : bf16
    %7 = vector.broadcast %cst_5 : bf16 to vector<64x1024xbf16>
    %8 = arith.maximumf %6, %7 : vector<64x1024xbf16>
    %c0_6 = arith.constant 0 : index
    %c0_7 = arith.constant 0 : index
    %9 = vector.load %arg4[%c0_6, %c0_7] : memref<32x64xbf16, #tpu.memory_space<vmem>>, vector<32x64xbf16>
    %cst_8 = arith.constant dense<0.000000e+00> : vector<32x1024xf32>
    %10 = tpu.matmul %9, %8, %cst_8 {dimension_numbers = #tpu.dot_dimension_numbers<[1], [0], [0], [1], [0, 0, 1, 1], [], []>} : vector<32x64xbf16>, vector<64x1024xbf16>, vector<32x1024xf32> -> vector<32x1024xf32>
    %11 = arith.truncf %10 : vector<32x1024xf32> to vector<32x1024xbf16>
    %c0_9 = arith.constant 0 : index
    %c0_10 = arith.constant 0 : index
    %12 = vector.load %arg5[%c0_9, %c0_10] : memref<32x1xbf16, #tpu.memory_space<vmem>>, vector<32x1xbf16>
    %13 = vector.broadcast %12 : vector<32x1xbf16> to vector<32x1024xbf16>
    %14 = arith.addf %11, %13 : vector<32x1024xbf16>
    %cst_11 = arith.constant 0.000000e+00 : bf16
    %15 = vector.broadcast %cst_11 : bf16 to vector<32x1024xbf16>
    %16 = arith.maximumf %14, %15 : vector<32x1024xbf16>
    %c0_12 = arith.constant 0 : index
    %c0_13 = arith.constant 0 : index
    %17 = vector.load %arg6[%c0_12, %c0_13] : memref<16x32xbf16, #tpu.memory_space<vmem>>, vector<16x32xbf16>
    %cst_14 = arith.constant dense<0.000000e+00> : vector<16x1024xf32>
    %18 = tpu.matmul %17, %16, %cst_14 {dimension_numbers = #tpu.dot_dimension_numbers<[1], [0], [0], [1], [0, 0, 1, 1], [], []>} : vector<16x32xbf16>, vector<32x1024xbf16>, vector<16x1024xf32> -> vector<16x1024xf32>
    %19 = arith.truncf %18 : vector<16x1024xf32> to vector<16x1024xbf16>
    %c0_15 = arith.constant 0 : index
    %c0_16 = arith.constant 0 : index
    %20 = vector.load %arg7[%c0_15, %c0_16] : memref<16x1xbf16, #tpu.memory_space<vmem>>, vector<16x1xbf16>
    %21 = vector.broadcast %20 : vector<16x1xbf16> to vector<16x1024xbf16>
    %22 = arith.addf %19, %21 : vector<16x1024xbf16>
    %c0_17 = arith.constant 0 : index
    %c0_18 = arith.constant 0 : index
    %23 = vector.load %arg8[%c0_17, %c0_18] : memref<32x16xbf16, #tpu.memory_space<vmem>>, vector<32x16xbf16>
    %cst_19 = arith.constant dense<0.000000e+00> : vector<32x1024xf32>
    %24 = tpu.matmul %23, %22, %cst_19 {dimension_numbers = #tpu.dot_dimension_numbers<[1], [0], [0], [1], [0, 0, 1, 1], [], []>} : vector<32x16xbf16>, vector<16x1024xbf16>, vector<32x1024xf32> -> vector<32x1024xf32>
    %25 = arith.truncf %24 : vector<32x1024xf32> to vector<32x1024xbf16>
    %c0_20 = arith.constant 0 : index
    %c0_21 = arith.constant 0 : index
    %26 = vector.load %arg9[%c0_20, %c0_21] : memref<32x1xbf16, #tpu.memory_space<vmem>>, vector<32x1xbf16>
    %27 = vector.broadcast %26 : vector<32x1xbf16> to vector<32x1024xbf16>
    %28 = arith.addf %25, %27 : vector<32x1024xbf16>
    %cst_22 = arith.constant 0.000000e+00 : bf16
    %29 = vector.broadcast %cst_22 : bf16 to vector<32x1024xbf16>
    %30 = arith.maximumf %28, %29 : vector<32x1024xbf16>
    %c0_23 = arith.constant 0 : index
    %c0_24 = arith.constant 0 : index
    %31 = vector.load %arg10[%c0_23, %c0_24] : memref<64x32xbf16, #tpu.memory_space<vmem>>, vector<64x32xbf16>
    %cst_25 = arith.constant dense<0.000000e+00> : vector<64x1024xf32>
    %32 = tpu.matmul %31, %30, %cst_25 {dimension_numbers = #tpu.dot_dimension_numbers<[1], [0], [0], [1], [0, 0, 1, 1], [], []>} : vector<64x32xbf16>, vector<32x1024xbf16>, vector<64x1024xf32> -> vector<64x1024xf32>
    %33 = arith.truncf %32 : vector<64x1024xf32> to vector<64x1024xbf16>
    %c0_26 = arith.constant 0 : index
    %c0_27 = arith.constant 0 : index
    %34 = vector.load %arg11[%c0_26, %c0_27] : memref<64x1xbf16, #tpu.memory_space<vmem>>, vector<64x1xbf16>
    %35 = vector.broadcast %34 : vector<64x1xbf16> to vector<64x1024xbf16>
    %36 = arith.addf %33, %35 : vector<64x1024xbf16>
    %cst_28 = arith.constant 0.000000e+00 : bf16
    %37 = vector.broadcast %cst_28 : bf16 to vector<64x1024xbf16>
    %38 = arith.maximumf %36, %37 : vector<64x1024xbf16>
    %c0_29 = arith.constant 0 : index
    %c0_30 = arith.constant 0 : index
    %39 = vector.load %arg12[%c0_29, %c0_30] : memref<32x64xbf16, #tpu.memory_space<vmem>>, vector<32x64xbf16>
    %cst_31 = arith.constant dense<0.000000e+00> : vector<32x1024xf32>
    %40 = tpu.matmul %39, %38, %cst_31 {dimension_numbers = #tpu.dot_dimension_numbers<[1], [0], [0], [1], [0, 0, 1, 1], [], []>} : vector<32x64xbf16>, vector<64x1024xbf16>, vector<32x1024xf32> -> vector<32x1024xf32>
    %41 = arith.truncf %40 : vector<32x1024xf32> to vector<32x1024xbf16>
    %c0_32 = arith.constant 0 : index
    %c0_33 = arith.constant 0 : index
    %42 = vector.load %arg13[%c0_32, %c0_33] : memref<32x1xbf16, #tpu.memory_space<vmem>>, vector<32x1xbf16>
    %43 = vector.broadcast %42 : vector<32x1xbf16> to vector<32x1024xbf16>
    %44 = arith.addf %41, %43 : vector<32x1024xbf16>
    %45 = arith.extf %44 : vector<32x1024xbf16> to vector<32x1024xf32>
    %c0_34 = arith.constant 0 : index
    %c0_35 = arith.constant 0 : index
    %46 = vector.load %arg14[%c0_34, %c0_35] : memref<32x1024xf32, #tpu.memory_space<vmem>>, vector<32x1024xf32>
    tpu.vector_store %arg14[%c0_34, %c0_35], %45 {strides = array<i32>} : memref<32x1024xf32, #tpu.memory_space<vmem>>, vector<32x1024xf32>,
    return
  }
  func.func @transform_0(%arg0: i32) -> (i32, i32) {
    %c0_i32 = arith.constant 0 : i32
    %c0_i32_0 = arith.constant 0 : i32
    return %c0_i32, %arg0 : i32, i32
  }
  func.func @transform_1(%arg0: i32) -> (i32, i32) {
    %c0_i32 = arith.constant 0 : i32
    %c0_i32_0 = arith.constant 0 : i32
    %c0_i32_1 = arith.constant 0 : i32
    return %c0_i32, %c0_i32_0 : i32, i32
  }
  func.func @transform_2(%arg0: i32) -> (i32, i32) {
    %c0_i32 = arith.constant 0 : i32
    %c0_i32_0 = arith.constant 0 : i32
    %c0_i32_1 = arith.constant 0 : i32
    return %c0_i32, %c0_i32_0 : i32, i32
  }
  func.func @transform_3(%arg0: i32) -> (i32, i32) {
    %c0_i32 = arith.constant 0 : i32
    %c0_i32_0 = arith.constant 0 : i32
    %c0_i32_1 = arith.constant 0 : i32
    return %c0_i32, %c0_i32_0 : i32, i32
  }
  func.func @transform_4(%arg0: i32) -> (i32, i32) {
    %c0_i32 = arith.constant 0 : i32
    %c0_i32_0 = arith.constant 0 : i32
    %c0_i32_1 = arith.constant 0 : i32
    return %c0_i32, %c0_i32_0 : i32, i32
  }
  func.func @transform_5(%arg0: i32) -> (i32, i32) {
    %c0_i32 = arith.constant 0 : i32
    %c0_i32_0 = arith.constant 0 : i32
    %c0_i32_1 = arith.constant 0 : i32
    return %c0_i32, %c0_i32_0 : i32, i32
  }
  func.func @transform_6(%arg0: i32) -> (i32, i32) {
    %c0_i32 = arith.constant 0 : i32
    %c0_i32_0 = arith.constant 0 : i32
    %c0_i32_1 = arith.constant 0 : i32
    return %c0_i32, %c0_i32_0 : i32, i32
  }
  func.func @transform_7(%arg0: i32) -> (i32, i32) {
    %c0_i32 = arith.constant 0 : i32
    %c0_i32_0 = arith.constant 0 : i32
    %c0_i32_1 = arith.constant 0 : i32
    return %c0_i32, %c0_i32_0 : i32, i32
  }
  func.func @transform_8(%arg0: i32) -> (i32, i32) {
    %c0_i32 = arith.constant 0 : i32
    %c0_i32_0 = arith.constant 0 : i32
    %c0_i32_1 = arith.constant 0 : i32
    return %c0_i32, %c0_i32_0 : i32, i32
  }
  func.func @transform_9(%arg0: i32) -> (i32, i32) {
    %c0_i32 = arith.constant 0 : i32
    %c0_i32_0 = arith.constant 0 : i32
    %c0_i32_1 = arith.constant 0 : i32
    return %c0_i32, %c0_i32_0 : i32, i32
  }
  func.func @transform_10(%arg0: i32) -> (i32, i32) {
    %c0_i32 = arith.constant 0 : i32
    %c0_i32_0 = arith.constant 0 : i32
    %c0_i32_1 = arith.constant 0 : i32
    return %c0_i32, %c0_i32_0 : i32, i32
  }
  func.func @transform_11(%arg0: i32) -> (i32, i32) {
    %c0_i32 = arith.constant 0 : i32
    %c0_i32_0 = arith.constant 0 : i32
    %c0_i32_1 = arith.constant 0 : i32
    return %c0_i32, %c0_i32_0 : i32, i32
  }
  func.func @transform_12(%arg0: i32) -> (i32, i32) {
    %c0_i32 = arith.constant 0 : i32
    %c0_i32_0 = arith.constant 0 : i32
    %c0_i32_1 = arith.constant 0 : i32
    return %c0_i32, %c0_i32_0 : i32, i32
  }
  func.func @transform_13(%arg0: i32) -> (i32, i32) {
    %c0_i32 = arith.constant 0 : i32
    %c0_i32_0 = arith.constant 0 : i32
    return %c0_i32, %arg0 : i32, i32
  }
}

</mosaic_0001>

<bundles_post_ra>
// kernel: tpu_custom_call.1
= control target key start
LH: loop header
LB: loop body
LE: loop exit
PB: predicated region body
PF: predicated region fallthrough
CT: control target
= control target key end

     0   :  { %v2735_v8 = vmov 0   ;;  %vm170_vm0 = vcmask 261120   ;;  %s3437_s0 = inlined_call_operand.vmem [shape: bf16[32,1024], index: 0, kind: input, shape index: {}]   ;;  %s3438_s1 = inlined_call_operand.vmem [shape: bf16[64,32], index: 1, kind: input, shape index: {}]   ;;  %s3439_s2 = inlined_call_operand.vmem [shape: bf16[64,1], index: 2, kind: input, shape index: {}]   ;;  %s3440_s3 = inlined_call_operand.vmem [shape: bf16[32,64], index: 3, kind: input, shape index: {}]   ;;  %s3441_s4 = inlined_call_operand.vmem [shape: bf16[32,1], index: 4, kind: input, shape index: {}]   ;;  %s3442_s5 = inlined_call_operand.vmem [shape: bf16[16,32], index: 5, kind: input, shape index: {}]   ;;  %s3443_s6 = inlined_call_operand.vmem [shape: bf16[16,1], index: 6, kind: input, shape index: {}]   ;;  %s3444_s7 = inlined_call_operand.vmem [shape: bf16[32,16], index: 7, kind: input, shape index: {}]   ;;  %s3445_s8 = inlined_call_operand.vmem [shape: bf16[32,1], index: 8, kind: input, shape index: {}]   ;;  %s3446_s9 = inlined_call_operand.vmem [shape: bf16[64,32], index: 9, kind: input, shape index: {}]   ;;  %s3447_s10 = inlined_call_operand.vmem [shape: bf16[64,1], index: 10, kind: input, shape index: {}]   ;;  %s3448_s11 = inlined_call_operand.vmem [shape: bf16[32,64], index: 11, kind: input, shape index: {}]   ;;  %s3449_s12 = inlined_call_operand.vmem [shape: bf16[32,1], index: 12, kind: input, shape index: {}]   ;;  %s3450_s13 = inlined_call_operand.hbm [shape: f32[32,1024], index: 13, kind: output, shape index: {}]  }
   0x1   :  { %v46_v0 = vld [vmem:[%s3437_s0] sm:$0xff]  ;;  %v47_v2 = vld [vmem:[%s3437_s0 + $0x8] sm:$0xff]  ;;  %215 = vmatprep.mubr.bf16.mxu0 %v2735_v8  ;;  %288 = vmatprep.mubr.bf16.mxu1 %v2735_v8  ;;  %v48_v17 = vld [vmem:[%s3437_s0 + $0x10] sm:$0xff] }
   0x2   :  { %v50_v1 = vld [vmem:[%s3437_s0 + $0x20] sm:$0xff]  ;;  %v51_v4 = vld [vmem:[%s3437_s0 + $0x28] sm:$0xff]  ;;  %2695 = vset.pattern.permute.xlu1 %v2735_v8  ;;  %2694 = vset.pattern.permute.xlu0 %v2735_v8  ;;  %v52_v18 = vld [vmem:[%s3437_s0 + $0x30] sm:$0xff] }
   0x3   :  { %v2588_v3 = vcombine.high %v46_v0, %v50_v1  ;;  %v2587_v5 = vcombine.low %v46_v0, %v50_v1  ;;  %v54_v6 = vld [vmem:[%s3437_s0 + $0x40] sm:$0xff]  ;;  %v2590_v9 = vcombine.high %v47_v2, %v51_v4  ;;  %v2589_v10 = vcombine.low %v47_v2, %v51_v4  ;;  %v55_v12 = vld [vmem:[%s3437_s0 + $0x48] sm:$0xff]  ;;  %v49_v19 = vld [vmem:[%s3437_s0 + $0x18] sm:$0xff] }
   0x4   :  { %v58_v7 = vld [vmem:[%s3437_s0 + $0x60] sm:$0xff]  ;;  %v59_v13 = vld [vmem:[%s3437_s0 + $0x68] sm:$0xff]  ;;  %v53_v20 = vld [vmem:[%s3437_s0 + $0x38] sm:$0xff]  ;;  %v2592_v22 = vcombine.high %v48_v17, %v52_v18  ;;  %v2591_v27 = vcombine.low %v48_v17, %v52_v18 }
   0x5   :  { %v2596_v11 = vcombine.high %v54_v6, %v58_v7  ;;  %183 = vmatprep.subr.bf16.mxu0 %v2588_v3  ;;  %v2598_v14 = vcombine.high %v55_v12, %v59_v13  ;;  %256 = vmatprep.subr.bf16.mxu1 %v2590_v9  ;;  %v2595_v15 = vcombine.low %v54_v6, %v58_v7  ;;  %v2853_v21 = vld [vmem:[%s3438_s1] sm:$0xff]   ;;  %v56_v24 = vld [vmem:[%s3437_s0 + $0x50] sm:$0xff]  ;;  %v57_v26 = vld [vmem:[%s3437_s0 + $0x58] sm:$0xff] }
   0x6   :  { %184 = vmatpush1.bf16.msra.mxu0 %v2587_v5  ;;  %257 = vmatpush1.bf16.msra.mxu1 %v2589_v10  ;;  %v2597_v16 = vcombine.low %v55_v12, %v59_v13  ;;  %v2594_v23 = vcombine.high %v49_v19, %v53_v20  ;;  %v60_v25 = vld [vmem:[%s3437_s0 + $0x70] sm:$0xff]  ;;  %v61_v28 = vld [vmem:[%s3437_s0 + $0x78] sm:$0xff]  ;;  %v509_v29 = vld [vmem:[%s3439_s2 + $0x8] sm:$0xf]  ;;  %v2593_v31 = vcombine.low %v49_v19, %v53_v20 }
   0x7   :  { %185 = vmatprep.subr.bf16.mxu0 %v2596_v11  ;;  %258 = vmatprep.subr.bf16.mxu1 %v2598_v14  ;;  %v507_v30 = vld [vmem:[%s3439_s2] sm:$0xf]  ;;  %v2600_v32 = vcombine.high %v56_v24, %v60_v25  ;;  %v2602_v33 = vcombine.high %v57_v26, %v61_v28  ;;  %v510_v34 = vld [vmem:[%s3439_s2 + $0xc] sm:$0xf]  ;;  %v2599_v35 = vcombine.low %v56_v24, %v60_v25  ;;  %v508_v36 = vld [vmem:[%s3439_s2 + $0x4] sm:$0xf] }
   0x8   :  { %541 = vperm.xlu1 %2695, %v509_v29   ;;  %517 = vperm.xlu0 %2694, %v507_v30   ;;  %v2601_v37 = vcombine.low %v57_v26, %v61_v28  ;;  %v2697_v38 = vld [vmem:[%s3438_s1 + $0x8] sm:$0xff]   ;;  %v512_v39 = vld [vmem:[%s3439_s2 + $0x14] sm:$0xf]  ;;  %v511_v40 = vld [vmem:[%s3439_s2 + $0x10] sm:$0xf] }
   0x9   :  { %v514_v41 = vld [vmem:[%s3439_s2 + $0x1c] sm:$0xf]  ;;  %v513_v42 = vld [vmem:[%s3439_s2 + $0x18] sm:$0xf]  ;;  %v2698_v43 = vld [vmem:[%s3438_s1 + $0x10] sm:$0xff]  }
   0xa   :  { %186 = vmatpush1.bf16.msra.mxu0 %v2595_v15  ;;  %259 = vmatpush1.bf16.msra.mxu1 %v2597_v16  ;;  %v949_v44 = vld [vmem:[%s3441_s4 + $0x4] sm:$0xf]  ;;  %v948_v45 = vld [vmem:[%s3441_s4] sm:$0xf] }
   0xb   :  { %329 = vmatprep.subr.bf16.mxu0 %v2592_v22  ;;  %402 = vmatprep.subr.bf16.mxu1 %v2594_v23 }
   0xc   :  { %553 = vperm.xlu1 %2695, %v510_v34   ;;  %529 = vperm.xlu0 %2694, %v508_v36  }
   0xd   :  { %2603 = vmatmul.mubr.msk.bf16.vlgmr.msra.gmra.mrb[0].mxu0 %vm170_vm0, %v2853_v21  ;;  %2607 = vmatmul.mubr.msk.bf16.vlgmr.msra.gmra.mrb[0].mxu1 %vm170_vm0, %v2853_v21 }
   0xe   :  { %225 = vmatprep.mubr.bf16.mxu0 %v2735_v8  ;;  %298 = vmatprep.mubr.bf16.mxu1 %v2735_v8 }
   0xf   :  { %330 = vmatpush1.bf16.msra.mxu0 %v2591_v27  ;;  %403 = vmatpush1.bf16.msra.mxu1 %v2593_v31 }
  0x10   :  { %331 = vmatprep.subr.bf16.mxu0 %v2600_v32  ;;  %404 = vmatprep.subr.bf16.mxu1 %v2602_v33 }
  0x11   :  { %577 = vperm.xlu1 %2695, %v512_v39   ;;  %565 = vperm.xlu0 %2694, %v511_v40  }
  0x13   :  { %332 = vmatpush1.bf16.msra.mxu0 %v2599_v35  ;;  %405 = vmatpush1.bf16.msra.mxu1 %v2601_v37 }
  0x15   :  { %2604 = vmatmul.mubr.msk.bf16.gmra.mrb[4].mxu0 %vm170_vm0, %v2697_v38  ;;  %2608 = vmatmul.mubr.msk.bf16.gmra.mrb[4].mxu1 %vm170_vm0, %v2697_v38 }
  0x16   :  { %235 = vmatprep.mubr.bf16.mxu0 %v2735_v8  ;;  %308 = vmatprep.mubr.bf16.mxu1 %v2735_v8 }
  0x17   :  { %601 = vperm.xlu1 %2695, %v514_v41   ;;  %589 = vperm.xlu0 %2694, %v513_v42  }
  0x18   :  { %18 = vsyncpa [#allocation3], 0  ;;  %v951_v46 = vld [vmem:[%s3441_s4 + $0xc] sm:$0xf]  ;;  %v950_v47 = vld [vmem:[%s3441_s4 + $0x8] sm:$0xf]  ;;  %v523_v5 = vlaneseq }
  0x19   :  { %v2699_v48 = vld [vmem:[%s3438_s1 + $0x18] sm:$0xff]   ;;  %v1235_v49 = vld [vmem:[%s3443_s6 + $0x4] sm:$0xf]  ;;  %v1234_v50 = vld [vmem:[%s3443_s6] sm:$0xf]  ;;  %vm713_vm1 = vcmask 523264  }
  0x1a   :  { %v1524_v51 = vld [vmem:[%s3445_s8 + $0x4] sm:$0xf]  ;;  %v1523_v52 = vld [vmem:[%s3445_s8] sm:$0xf]  ;;  %v1526_v53 = vld [vmem:[%s3445_s8 + $0xc] sm:$0xf] }
  0x1b   :  { %966 = vperm.xlu1 %2695, %v949_v44   ;;  %954 = vperm.xlu0 %2694, %v948_v45   ;;  %v1525_v54 = vld [vmem:[%s3445_s8 + $0x8] sm:$0xf]  ;;  %v1984_v55 = vld [vmem:[%s3447_s10 + $0x4] sm:$0xf]  ;;  %v1983_v56 = vld [vmem:[%s3447_s10] sm:$0xf] }
  0x1c   :  { %v1986_v57 = vld [vmem:[%s3447_s10 + $0xc] sm:$0xf]  ;;  %v1985_v58 = vld [vmem:[%s3447_s10 + $0x8] sm:$0xf]  ;;  %v1988_v59 = vld [vmem:[%s3447_s10 + $0x14] sm:$0xf] }
  0x1d   :  { %2605 = vmatmul.mubr.msk.bf16.gmra.mrb[8].mxu0 %vm170_vm0, %v2698_v43  ;;  %2609 = vmatmul.mubr.msk.bf16.gmra.mrb[8].mxu1 %vm170_vm0, %v2698_v43  ;;  %v1987_v60 = vld [vmem:[%s3447_s10 + $0x10] sm:$0xf]  ;;  %v1990_v61 = vld [vmem:[%s3447_s10 + $0x1c] sm:$0xf]  ;;  %v1989_v62 = vld [vmem:[%s3447_s10 + $0x18] sm:$0xf] }
  0x1e   :  { %245 = vmatprep.mubr.bf16.mxu0 %v2735_v8  ;;  %318 = vmatprep.mubr.bf16.mxu1 %v2735_v8  ;;  %v2424_v63 = vld [vmem:[%s3449_s12 + $0x4] sm:$0xf]  ;;  %v2423_v0 = vld [vmem:[%s3449_s12] sm:$0xf]  ;;  %v2426_v1 = vld [vmem:[%s3449_s12 + $0xc] sm:$0xf] }
  0x1f   :  { %990 = vperm.xlu1 %2695, %v951_v46   ;;  %978 = vperm.xlu0 %2694, %v950_v47   ;;  %v2425_v2 = vld [vmem:[%s3449_s12 + $0x8] sm:$0xf]  ;;  %v2736_v3 = vmov 839922192   ;;  %v524_v7 = vshrl.u32 %v523_v5, 7  ;;  %vm1288_vm2 = vcmask 130048  }
  0x20   :  { %v521_v4 = vunpack.c.l.s4 %v2736_v3 }
  0x22   :  { %v522_v6 = vunpack.c.0.s8 %v521_v4 }
  0x23   :  { %1250 = vperm.xlu1 %2695, %v1235_v49   ;;  %1238 = vperm.xlu0 %2694, %v1234_v50  }
  0x24   :  { %v3002_v10 = vsub.s32 %v522_v6, %v524_v7 }
  0x25   :  { %2606 = vmatmul.mubr.msk.bf16.gmra.mrb[12].mxu0 %vm170_vm0, %v2699_v48  ;;  %2610 = vmatmul.mubr.msk.bf16.gmra.mrb[12].mxu1 %vm170_vm0, %v2699_v48 }
  0x26   :  { %361 = vmatprep.mubr.bf16.mxu0 %v2735_v8  ;;  %434 = vmatprep.mubr.bf16.mxu1 %v2735_v8 }
  0x27   :  { %1541 = vperm.xlu1 %2695, %v1524_v51   ;;  %1529 = vperm.xlu0 %2694, %v1523_v52  }
  0x2b   :  { %1565 = vperm.xlu1 %2695, %v1526_v53   ;;  %1553 = vperm.xlu0 %2694, %v1525_v54  }
  0x2d   :  { %2611 = vmatmul.mubr.msk.bf16.vlgmr.msra.gmra.mrb[16].mxu0 %vm170_vm0, %v2853_v21  ;;  %2615 = vmatmul.mubr.msk.bf16.vlgmr.msra.gmra.mrb[16].mxu1 %vm170_vm0, %v2853_v21 }
  0x2e   :  { %371 = vmatprep.mubr.bf16.mxu0 %v2735_v8  ;;  %444 = vmatprep.mubr.bf16.mxu1 %v2735_v8 }
  0x2f   :  { %2005 = vperm.xlu1 %2695, %v1984_v55   ;;  %1993 = vperm.xlu0 %2694, %v1983_v56  }
  0x33   :  { %2029 = vperm.xlu1 %2695, %v1986_v57   ;;  %2017 = vperm.xlu0 %2694, %v1985_v58  }
  0x35   :  { %2612 = vmatmul.mubr.msk.bf16.gmra.mrb[20].mxu0 %vm170_vm0, %v2697_v38  ;;  %2616 = vmatmul.mubr.msk.bf16.gmra.mrb[20].mxu1 %vm170_vm0, %v2697_v38 }
  0x36   :  { %381 = vmatprep.mubr.bf16.mxu0 %v2735_v8  ;;  %454 = vmatprep.mubr.bf16.mxu1 %v2735_v8 }
  0x37   :  { %2053 = vperm.xlu1 %2695, %v1988_v59   ;;  %2041 = vperm.xlu0 %2694, %v1987_v60  }
  0x3b   :  { %2077 = vperm.xlu1 %2695, %v1990_v61   ;;  %2065 = vperm.xlu0 %2694, %v1989_v62  }
  0x3d   :  { %2613 = vmatmul.mubr.msk.bf16.gmra.mrb[24].mxu0 %vm170_vm0, %v2698_v43  ;;  %2617 = vmatmul.mubr.msk.bf16.gmra.mrb[24].mxu1 %vm170_vm0, %v2698_v43 }
  0x3e   :  { %391 = vmatprep.mubr.bf16.mxu0 %v2735_v8  ;;  %464 = vmatprep.mubr.bf16.mxu1 %v2735_v8 }
  0x3f   :  { %2441 = vperm.xlu1 %2695, %v2424_v63   ;;  %2429 = vperm.xlu0 %2694, %v2423_v0  }
  0x43   :  { %2465 = vperm.xlu1 %2695, %v2426_v1   ;;  %2453 = vperm.xlu0 %2694, %v2425_v2  }
  0x45   :  { %2614 = vmatmul.mubr.msk.bf16.gmra.mrb[28].mxu0 %vm170_vm0, %v2699_v48  ;;  %2618 = vmatmul.mubr.msk.bf16.gmra.mrb[28].mxu1 %vm170_vm0, %v2699_v48 }
  0x46   :  { %752 = vmatprep.mubr.bf16.mxu0 %v2735_v8  ;;  %805 = vmatprep.mubr.bf16.mxu1 %v2735_v8 }
  0x87   :  { %v518_v9 = vpop.permute.xlu0 %517  ;;  %v542_v14 = vpop.permute.xlu1 %541 }
  0x88   :  { %v526_v12 = vrot.slane %v518_v9, %v3002_v10  ;;  %v550_v28 = vrot.slane %v542_v14, %v3002_v10 }
  0x8b   :  { %v530_v11 = vpop.permute.xlu0 %529  ;;  %v554_v24 = vpop.permute.xlu1 %553 }
  0x8c   :  { %v538_v13 = vrot.slane %v530_v11, %v3002_v10  ;;  %v562_v29 = vrot.slane %v554_v24, %v3002_v10 }
  0x8e   :  { %v3006_v16 = vcombine.low %v526_v12, %v538_v13  ;;  %v3015_v37 = vcombine.low %v550_v28, %v562_v29 }
  0x90   :  { %v578_v53 = vpop.permute.xlu1 %577  ;;  %v566_v54 = vpop.permute.xlu0 %565 }
  0x91   :  { %v586_v57 = vrot.slane %v578_v53, %v3002_v10  ;;  %v574_v58 = vrot.slane %v566_v54, %v3002_v10 }
  0x93   :  { %v3030_v5 = vcombine.low %v574_v58, %v586_v57 }
  0xe0   :  { %v217_v15 = vpop.f32.mrb[0].mxu0  ;;  %v290_v17 = vpop.f32.mrb[0].mxu1 }
  0xe1   :  { %v219_v18 = vpop.f32.mrb[1].mxu0  ;;  %v292_v19 = vpop.f32.mrb[1].mxu1 }
  0xe2   :  { %v221_v20 = vpop.f32.mrb[2].mxu0  ;;  %v294_v22 = vpop.f32.mrb[2].mxu1 }
  0xe3   :  { %v475_v21 = vpack.c.bf16 %v221_v20, %v217_v15  ;;  %v223_v23 = vpop.f32.mrb[3].mxu0  ;;  %v477_v25 = vpack.c.bf16 %v294_v22, %v290_v17  ;;  %v296_v27 = vpop.f32.mrb[3].mxu1 }
  0xe4   :  { %v476_v26 = vpack.c.bf16 %v223_v23, %v219_v18  ;;  %v478_v31 = vpack.c.bf16 %v296_v27, %v292_v19  ;;  %v602_v17 = vpop.permute.xlu1 %601  ;;  %v590_v18 = vpop.permute.xlu0 %589 }
  0xe5   :  { %v635_v30 = vadd.bf16 %v3006_v16, %v475_v21  ;;  %v637_v32 = vadd.bf16 %v3006_v16, %v477_v25  ;;  %v610_v21 = vrot.slane %v602_v17, %v3002_v10  ;;  %v598_v22 = vrot.slane %v590_v18, %v3002_v10 }
  0xe6   :  { %v636_v33 = vadd.bf16 %v3006_v16, %v476_v26  ;;  %v638_v34 = vadd.bf16 %v3006_v16, %v478_v31 }
  0xe7   :  { %v667_v38 = vmax.bf16 %v2735_v8, %v635_v30  ;;  %v669_v42 = vmax.bf16 %v2735_v8, %v637_v32 }
  0xe8   :  { %v227_v35 = vpop.f32.mrb[4].mxu0  ;;  %v668_v36 = vmax.bf16 %v2735_v8, %v636_v33  ;;  %v300_v39 = vpop.f32.mrb[4].mxu1  ;;  %v670_v41 = vmax.bf16 %v2735_v8, %v638_v34  ;;  %v3042_v33 = vcombine.low %v598_v22, %v610_v21 }
  0xe9   :  { %v229_v40 = vpop.f32.mrb[5].mxu0  ;;  %v302_v43 = vpop.f32.mrb[5].mxu1 }
  0xea   :  { %v231_v44 = vpop.f32.mrb[6].mxu0  ;;  %720 = vmatprep.subr.bf16.mxu0 %v668_v36  ;;  %v304_v46 = vpop.f32.mrb[6].mxu1  ;;  %773 = vmatprep.subr.bf16.mxu1 %v670_v41 }
  0xeb   :  { %v483_v45 = vpack.c.bf16 %v231_v44, %v227_v35  ;;  %v233_v47 = vpop.f32.mrb[7].mxu0  ;;  %721 = vmatpush1.bf16.msra.mxu0 %v667_v38  ;;  %v485_v48 = vpack.c.bf16 %v304_v46, %v300_v39  ;;  %v306_v50 = vpop.f32.mrb[7].mxu1  ;;  %774 = vmatpush1.bf16.msra.mxu1 %v669_v42 }
  0xec   :  { %v484_v49 = vpack.c.bf16 %v233_v47, %v229_v40  ;;  %v486_v52 = vpack.c.bf16 %v306_v50, %v302_v43 }
  0xed   :  { %v643_v51 = vadd.bf16 %v3015_v37, %v483_v45  ;;  %v645_v55 = vadd.bf16 %v3015_v37, %v485_v48 }
  0xee   :  { %v644_v56 = vadd.bf16 %v3015_v37, %v484_v49  ;;  %v646_v59 = vadd.bf16 %v3015_v37, %v486_v52 }
  0xef   :  { %v675_v62 = vmax.bf16 %v2735_v8, %v643_v51  ;;  %v677_v2 = vmax.bf16 %v2735_v8, %v645_v55  ;;  %v3055_v55 = vld [vmem:[%s3440_s3] sm:$0xff]  }
  0xf0   :  { %v237_v60 = vpop.f32.mrb[8].mxu0  ;;  %v676_v61 = vmax.bf16 %v2735_v8, %v644_v56  ;;  %v310_v63 = vpop.f32.mrb[8].mxu1  ;;  %v678_v1 = vmax.bf16 %v2735_v8, %v646_v59 }
  0xf1   :  { %v239_v0 = vpop.f32.mrb[9].mxu0  ;;  %v312_v3 = vpop.f32.mrb[9].mxu1 }
  0xf2   :  { %v241_v4 = vpop.f32.mrb[10].mxu0  ;;  %722 = vmatprep.subr.bf16.mxu0 %v676_v61  ;;  %v314_v7 = vpop.f32.mrb[10].mxu1  ;;  %775 = vmatprep.subr.bf16.mxu1 %v678_v1 }
  0xf3   :  { %v491_v6 = vpack.c.bf16 %v241_v4, %v237_v60  ;;  %v243_v9 = vpop.f32.mrb[11].mxu0  ;;  %723 = vmatpush1.bf16.msra.mxu0 %v675_v62  ;;  %v493_v11 = vpack.c.bf16 %v314_v7, %v310_v63  ;;  %v316_v13 = vpop.f32.mrb[11].mxu1  ;;  %776 = vmatpush1.bf16.msra.mxu1 %v677_v2 }
  0xf4   :  { %v492_v12 = vpack.c.bf16 %v243_v9, %v239_v0  ;;  %v494_v15 = vpack.c.bf16 %v316_v13, %v312_v3 }
  0xf5   :  { %v651_v14 = vadd.bf16 %v3030_v5, %v491_v6  ;;  %v653_v19 = vadd.bf16 %v3030_v5, %v493_v11 }
  0xf6   :  { %v652_v20 = vadd.bf16 %v3030_v5, %v492_v12  ;;  %v654_v23 = vadd.bf16 %v3030_v5, %v494_v15 }
  0xf7   :  { %v683_v26 = vmax.bf16 %v2735_v8, %v651_v14  ;;  %v685_v30 = vmax.bf16 %v2735_v8, %v653_v19  ;;  %v3074_v14 = vld [vmem:[%s3440_s3 + $0x8] sm:$0xff]  }
  0xf8   :  { %v247_v24 = vpop.f32.mrb[12].mxu0  ;;  %v684_v25 = vmax.bf16 %v2735_v8, %v652_v20  ;;  %v320_v27 = vpop.f32.mrb[12].mxu1  ;;  %v686_v29 = vmax.bf16 %v2735_v8, %v654_v23 }
  0xf9   :  { %v249_v28 = vpop.f32.mrb[13].mxu0  ;;  %v322_v31 = vpop.f32.mrb[13].mxu1 }
  0xfa   :  { %v251_v32 = vpop.f32.mrb[14].mxu0  ;;  %724 = vmatprep.subr.bf16.mxu0 %v684_v25  ;;  %v324_v35 = vpop.f32.mrb[14].mxu1  ;;  %777 = vmatprep.subr.bf16.mxu1 %v686_v29 }
  0xfb   :  { %v499_v34 = vpack.c.bf16 %v251_v32, %v247_v24  ;;  %v253_v36 = vpop.f32.mrb[15].mxu0  ;;  %725 = vmatpush1.bf16.msra.mxu0 %v683_v26  ;;  %v501_v38 = vpack.c.bf16 %v324_v35, %v320_v27  ;;  %v326_v40 = vpop.f32.mrb[15].mxu1  ;;  %778 = vmatpush1.bf16.msra.mxu1 %v685_v30 }
  0xfc   :  { %v500_v39 = vpack.c.bf16 %v253_v36, %v249_v28  ;;  %v502_v42 = vpack.c.bf16 %v326_v40, %v322_v31 }
  0xfd   :  { %v659_v41 = vadd.bf16 %v3042_v33, %v499_v34  ;;  %v661_v43 = vadd.bf16 %v3042_v33, %v501_v38 }
  0xfe   :  { %v660_v44 = vadd.bf16 %v3042_v33, %v500_v39  ;;  %v662_v45 = vadd.bf16 %v3042_v33, %v502_v42 }
  0xff   :  { %v691_v48 = vmax.bf16 %v2735_v8, %v659_v41  ;;  %v693_v52 = vmax.bf16 %v2735_v8, %v661_v43 }
 0x100   :  { %v363_v46 = vpop.f32.mrb[16].mxu0  ;;  %v692_v47 = vmax.bf16 %v2735_v8, %v660_v44  ;;  %v436_v49 = vpop.f32.mrb[16].mxu1  ;;  %v694_v51 = vmax.bf16 %v2735_v8, %v662_v45 }
 0x101   :  { %v365_v50 = vpop.f32.mrb[17].mxu0  ;;  %v438_v53 = vpop.f32.mrb[17].mxu1 }
 0x102   :  { %v367_v54 = vpop.f32.mrb[18].mxu0  ;;  %726 = vmatprep.subr.bf16.mxu0 %v692_v47  ;;  %v440_v57 = vpop.f32.mrb[18].mxu1  ;;  %779 = vmatprep.subr.bf16.mxu1 %v694_v51 }
 0x103   :  { %v479_v56 = vpack.c.bf16 %v367_v54, %v363_v46  ;;  %v369_v58 = vpop.f32.mrb[19].mxu0  ;;  %727 = vmatpush1.bf16.msra.mxu0 %v691_v48  ;;  %v481_v59 = vpack.c.bf16 %v440_v57, %v436_v49  ;;  %v442_v61 = vpop.f32.mrb[19].mxu1  ;;  %780 = vmatpush1.bf16.msra.mxu1 %v693_v52 }
 0x104   :  { %v480_v60 = vpack.c.bf16 %v369_v58, %v365_v50  ;;  %v482_v63 = vpack.c.bf16 %v442_v61, %v438_v53 }
 0x105   :  { %v639_v62 = vadd.bf16 %v3006_v16, %v479_v56  ;;  %v641_v0 = vadd.bf16 %v3006_v16, %v481_v59 }
 0x106   :  { %v640_v1 = vadd.bf16 %v3006_v16, %v480_v60  ;;  %2625 = vmatmul.mubr.msk.bf16.vlgmr.msra.gmra.mrb[32].mxu0 %vm713_vm1, %v3055_v55  ;;  %v642_v2 = vadd.bf16 %v3006_v16, %v482_v63  ;;  %2627 = vmatmul.mubr.msk.bf16.vlgmr.msra.gmra.mrb[32].mxu1 %vm713_vm1, %v3055_v55 }
 0x107   :  { %762 = vmatprep.mubr.bf16.mxu0 %v2735_v8  ;;  %815 = vmatprep.mubr.bf16.mxu1 %v2735_v8  ;;  %v671_v6 = vmax.bf16 %v2735_v8, %v639_v62  ;;  %v673_v12 = vmax.bf16 %v2735_v8, %v641_v0 }
 0x108   :  { %v373_v3 = vpop.f32.mrb[20].mxu0  ;;  %v672_v4 = vmax.bf16 %v2735_v8, %v640_v1  ;;  %v446_v7 = vpop.f32.mrb[20].mxu1  ;;  %v674_v11 = vmax.bf16 %v2735_v8, %v642_v2 }
 0x109   :  { %v375_v9 = vpop.f32.mrb[21].mxu0  ;;  %v448_v13 = vpop.f32.mrb[21].mxu1 }
 0x10a   :  { %v377_v16 = vpop.f32.mrb[22].mxu0  ;;  %826 = vmatprep.subr.bf16.mxu0 %v672_v4  ;;  %v450_v17 = vpop.f32.mrb[22].mxu1  ;;  %879 = vmatprep.subr.bf16.mxu1 %v674_v11 }
 0x10b   :  { %v487_v15 = vpack.c.bf16 %v377_v16, %v373_v3  ;;  %v379_v18 = vpop.f32.mrb[23].mxu0  ;;  %827 = vmatpush1.bf16.msra.mxu0 %v671_v6  ;;  %v489_v19 = vpack.c.bf16 %v450_v17, %v446_v7  ;;  %v452_v21 = vpop.f32.mrb[23].mxu1  ;;  %880 = vmatpush1.bf16.msra.mxu1 %v673_v12 }
 0x10c   :  { %v488_v20 = vpack.c.bf16 %v379_v18, %v375_v9  ;;  %v490_v23 = vpack.c.bf16 %v452_v21, %v448_v13  ;;  %v955_v11 = vpop.permute.xlu0 %954 }
 0x10d   :  { %v647_v22 = vadd.bf16 %v3015_v37, %v487_v15  ;;  %v649_v24 = vadd.bf16 %v3015_v37, %v489_v19 }
 0x10e   :  { %v648_v25 = vadd.bf16 %v3015_v37, %v488_v20  ;;  %2626 = vmatmul.mubr.msk.bf16.gmra.mrb[36].mxu0 %vm713_vm1, %v3074_v14  ;;  %v650_v26 = vadd.bf16 %v3015_v37, %v490_v23  ;;  %2628 = vmatmul.mubr.msk.bf16.gmra.mrb[36].mxu1 %vm713_vm1, %v3074_v14 }
 0x10f   :  { %858 = vmatprep.mubr.bf16.mxu0 %v2735_v8  ;;  %911 = vmatprep.mubr.bf16.mxu1 %v2735_v8  ;;  %v679_v29 = vmax.bf16 %v2735_v8, %v647_v22  ;;  %v681_v34 = vmax.bf16 %v2735_v8, %v649_v24 }
 0x110   :  { %v383_v27 = vpop.f32.mrb[24].mxu0  ;;  %v680_v28 = vmax.bf16 %v2735_v8, %v648_v25  ;;  %v456_v30 = vpop.f32.mrb[24].mxu1  ;;  %v682_v32 = vmax.bf16 %v2735_v8, %v650_v26 }
 0x111   :  { %v385_v31 = vpop.f32.mrb[25].mxu0  ;;  %v458_v35 = vpop.f32.mrb[25].mxu1 }
 0x112   :  { %v387_v37 = vpop.f32.mrb[26].mxu0  ;;  %828 = vmatprep.subr.bf16.mxu0 %v680_v28  ;;  %v460_v38 = vpop.f32.mrb[26].mxu1  ;;  %881 = vmatprep.subr.bf16.mxu1 %v682_v32 }
 0x113   :  { %v495_v36 = vpack.c.bf16 %v387_v37, %v383_v27  ;;  %v389_v39 = vpop.f32.mrb[27].mxu0  ;;  %829 = vmatpush1.bf16.msra.mxu0 %v679_v29  ;;  %v497_v40 = vpack.c.bf16 %v460_v38, %v456_v30  ;;  %v462_v42 = vpop.f32.mrb[27].mxu1  ;;  %882 = vmatpush1.bf16.msra.mxu1 %v681_v34 }
 0x114   :  { %v496_v41 = vpack.c.bf16 %v389_v39, %v385_v31  ;;  %v498_v44 = vpack.c.bf16 %v462_v42, %v458_v35  ;;  %v979_v28 = vpop.permute.xlu0 %978 }
 0x115   :  { %v655_v43 = vadd.bf16 %v3030_v5, %v495_v36  ;;  %v657_v45 = vadd.bf16 %v3030_v5, %v497_v40  ;;  %v987_v32 = vrot.slane %v979_v28, %v3002_v10 }
 0x116   :  { %v656_v46 = vadd.bf16 %v3030_v5, %v496_v41  ;;  %v658_v47 = vadd.bf16 %v3030_v5, %v498_v44 }
 0x117   :  { %v687_v50 = vmax.bf16 %v2735_v8, %v655_v43  ;;  %v689_v54 = vmax.bf16 %v2735_v8, %v657_v45 }
 0x118   :  { %v393_v48 = vpop.f32.mrb[28].mxu0  ;;  %v688_v49 = vmax.bf16 %v2735_v8, %v656_v46  ;;  %v466_v51 = vpop.f32.mrb[28].mxu1  ;;  %v690_v53 = vmax.bf16 %v2735_v8, %v658_v47 }
 0x119   :  { %v395_v52 = vpop.f32.mrb[29].mxu0  ;;  %v468_v56 = vpop.f32.mrb[29].mxu1 }
 0x11a   :  { %v397_v57 = vpop.f32.mrb[30].mxu0  ;;  %830 = vmatprep.subr.bf16.mxu0 %v688_v49  ;;  %v470_v59 = vpop.f32.mrb[30].mxu1  ;;  %883 = vmatprep.subr.bf16.mxu1 %v690_v53 }
 0x11b   :  { %v503_v58 = vpack.c.bf16 %v397_v57, %v393_v48  ;;  %v399_v60 = vpop.f32.mrb[31].mxu0  ;;  %831 = vmatpush1.bf16.msra.mxu0 %v687_v50  ;;  %v505_v5 = vpack.c.bf16 %v470_v59, %v466_v51  ;;  %v472_v62 = vpop.f32.mrb[31].mxu1  ;;  %884 = vmatpush1.bf16.msra.mxu1 %v689_v54 }
 0x11c   :  { %v504_v61 = vpack.c.bf16 %v399_v60, %v395_v52  ;;  %v506_v0 = vpack.c.bf16 %v472_v62, %v468_v56 }
 0x11d   :  { %v663_v63 = vadd.bf16 %v3042_v33, %v503_v58  ;;  %v665_v1 = vadd.bf16 %v3042_v33, %v505_v5  ;;  %v2702_v5 = vld [vmem:[%s3442_s5] sm:$0xff]  }
 0x11e   :  { %v664_v2 = vadd.bf16 %v3042_v33, %v504_v61  ;;  %v666_v3 = vadd.bf16 %v3042_v33, %v506_v0  ;;  %v967_v33 = vpop.permute.xlu1 %966 }
 0x11f   :  { %v695_v6 = vmax.bf16 %v2735_v8, %v663_v63  ;;  %v697_v9 = vmax.bf16 %v2735_v8, %v665_v1  ;;  %v975_v12 = vrot.slane %v967_v33, %v3002_v10 }
 0x120   :  { %v696_v4 = vmax.bf16 %v2735_v8, %v664_v2  ;;  %v698_v7 = vmax.bf16 %v2735_v8, %v666_v3 }
 0x122   :  { %832 = vmatprep.subr.bf16.mxu0 %v696_v4  ;;  %885 = vmatprep.subr.bf16.mxu1 %v698_v7  ;;  %v991_v27 = vpop.permute.xlu1 %990 }
 0x123   :  { %833 = vmatpush1.bf16.msra.mxu0 %v695_v6  ;;  %886 = vmatpush1.bf16.msra.mxu1 %v697_v9  ;;  %v999_v31 = vrot.slane %v991_v27, %v3002_v10 }
 0x125   :  { %v3132_v44 = vcombine.low %v987_v32, %v999_v31 }
 0x126   :  { %2629 = vmatmul.mubr.msk.bf16.vlgmr.msra.gmra.mrb[40].mxu0 %vm713_vm1, %v3055_v55  ;;  %2631 = vmatmul.mubr.msk.bf16.vlgmr.msra.gmra.mrb[40].mxu1 %vm713_vm1, %v3055_v55  ;;  %v963_v55 = vrot.slane %v955_v11, %v3002_v10 }
 0x127   :  { %868 = vmatprep.mubr.bf16.mxu0 %v2735_v8  ;;  %921 = vmatprep.mubr.bf16.mxu1 %v2735_v8 }
 0x128   :  { %v3120_v19 = vcombine.low %v963_v55, %v975_v12 }
 0x12e   :  { %2630 = vmatmul.mubr.msk.bf16.gmra.mrb[44].mxu0 %vm713_vm1, %v3074_v14  ;;  %2632 = vmatmul.mubr.msk.bf16.gmra.mrb[44].mxu1 %vm713_vm1, %v3074_v14 }
 0x12f   :  { %1086 = vmatprep.mubr.bf16.mxu0 %v2735_v8  ;;  %1129 = vmatprep.mubr.bf16.mxu1 %v2735_v8 }
 0x1d9   :  { %v754_v13 = vpop.f32.mrb[32].mxu0  ;;  %v807_v16 = vpop.f32.mrb[32].mxu1 }
 0x1da   :  { %v756_v15 = vpop.f32.mrb[33].mxu0  ;;  %v809_v17 = vpop.f32.mrb[33].mxu1 }
 0x1db   :  { %v758_v18 = vpop.f32.mrb[34].mxu0  ;;  %v811_v21 = vpop.f32.mrb[34].mxu1 }
 0x1dc   :  { %v932_v20 = vpack.c.bf16 %v758_v18, %v754_v13  ;;  %v760_v14 = vpop.f32.mrb[35].mxu0  ;;  %v934_v22 = vpack.c.bf16 %v811_v21, %v807_v16  ;;  %v813_v24 = vpop.f32.mrb[35].mxu1 }
 0x1dd   :  { %v933_v23 = vpack.c.bf16 %v760_v14, %v756_v15  ;;  %v935_v26 = vpack.c.bf16 %v813_v24, %v809_v17 }
 0x1de   :  { %v1012_v25 = vadd.bf16 %v3120_v19, %v932_v20  ;;  %v1014_v29 = vadd.bf16 %v3120_v19, %v934_v22 }
 0x1df   :  { %v1013_v30 = vadd.bf16 %v3120_v19, %v933_v23  ;;  %v1015_v34 = vadd.bf16 %v3120_v19, %v935_v26 }
 0x1e0   :  { %v1028_v36 = vmax.bf16 %v2735_v8, %v1012_v25  ;;  %v1030_v41 = vmax.bf16 %v2735_v8, %v1014_v29 }
 0x1e1   :  { %v764_v35 = vpop.f32.mrb[36].mxu0  ;;  %v1029_v37 = vmax.bf16 %v2735_v8, %v1013_v30  ;;  %v817_v38 = vpop.f32.mrb[36].mxu1  ;;  %v1031_v40 = vmax.bf16 %v2735_v8, %v1015_v34 }
 0x1e2   :  { %v766_v39 = vpop.f32.mrb[37].mxu0  ;;  %v819_v42 = vpop.f32.mrb[37].mxu1 }
 0x1e3   :  { %v768_v43 = vpop.f32.mrb[38].mxu0  ;;  %1054 = vmatprep.subr.bf16.mxu0 %v1029_v37  ;;  %v821_v46 = vpop.f32.mrb[38].mxu1  ;;  %1097 = vmatprep.subr.bf16.mxu1 %v1031_v40 }
 0x1e4   :  { %v940_v45 = vpack.c.bf16 %v768_v43, %v764_v35  ;;  %v770_v47 = vpop.f32.mrb[39].mxu0  ;;  %1055 = vmatpush1.bf16.msra.mxu0 %v1028_v36  ;;  %v942_v48 = vpack.c.bf16 %v821_v46, %v817_v38  ;;  %v823_v50 = vpop.f32.mrb[39].mxu1  ;;  %1098 = vmatpush1.bf16.msra.mxu1 %v1030_v41 }
 0x1e5   :  { %v941_v49 = vpack.c.bf16 %v770_v47, %v766_v39  ;;  %v943_v52 = vpack.c.bf16 %v823_v50, %v819_v42  ;;  %v1251_v39 = vpop.permute.xlu1 %1250  ;;  %v1239_v40 = vpop.permute.xlu0 %1238 }
 0x1e6   :  { %v1020_v51 = vadd.bf16 %v3132_v44, %v940_v45  ;;  %v1022_v53 = vadd.bf16 %v3132_v44, %v942_v48  ;;  %v1259_v41 = vrot.slane %v1251_v39, %v3002_v10  ;;  %v1247_v42 = vrot.slane %v1239_v40, %v3002_v10 }
 0x1e7   :  { %v1021_v54 = vadd.bf16 %v3132_v44, %v941_v49  ;;  %v1023_v56 = vadd.bf16 %v3132_v44, %v943_v52 }
 0x1e8   :  { %v1036_v58 = vmax.bf16 %v2735_v8, %v1020_v51  ;;  %v1038_v60 = vmax.bf16 %v2735_v8, %v1022_v53  ;;  %v2640_v48 = vcombine.low %v1247_v42, %v1259_v41 }
 0x1e9   :  { %v1037_v57 = vmax.bf16 %v2735_v8, %v1021_v54  ;;  %v1039_v59 = vmax.bf16 %v2735_v8, %v1023_v56 }
 0x1eb   :  { %1056 = vmatprep.subr.bf16.mxu0 %v1037_v57  ;;  %1099 = vmatprep.subr.bf16.mxu1 %v1039_v59 }
 0x1ec   :  { %1057 = vmatpush1.bf16.msra.mxu0 %v1036_v58  ;;  %1100 = vmatpush1.bf16.msra.mxu1 %v1038_v60 }
 0x1ef   :  { %2636 = vmatmul.mubr.msk.bf16.vlgmr.msra.gmra.mrb[48].mxu0 %vm170_vm0, %v2702_v5  ;;  %2637 = vmatmul.mubr.msk.bf16.vlgmr.msra.gmra.mrb[48].mxu1 %vm170_vm0, %v2702_v5 }
 0x1f0   :  { %1172 = vmatprep.mubr.bf16.mxu0 %v2735_v8  ;;  %1215 = vmatprep.mubr.bf16.mxu1 %v2735_v8 }
 0x1f9   :  { %v860_v61 = vpop.f32.mrb[40].mxu0  ;;  %v913_v62 = vpop.f32.mrb[40].mxu1 }
 0x1fa   :  { %v862_v63 = vpop.f32.mrb[41].mxu0  ;;  %v915_v0 = vpop.f32.mrb[41].mxu1 }
 0x1fb   :  { %v864_v1 = vpop.f32.mrb[42].mxu0  ;;  %v917_v3 = vpop.f32.mrb[42].mxu1 }
 0x1fc   :  { %v936_v2 = vpack.c.bf16 %v864_v1, %v860_v61  ;;  %v866_v4 = vpop.f32.mrb[43].mxu0  ;;  %v938_v6 = vpack.c.bf16 %v917_v3, %v913_v62  ;;  %v919_v9 = vpop.f32.mrb[43].mxu1  ;;  %v2704_v61 = vld [vmem:[%s3444_s7 + $0x8] sm:$0xff]  }
 0x1fd   :  { %v937_v7 = vpack.c.bf16 %v866_v4, %v862_v63  ;;  %v939_v11 = vpack.c.bf16 %v919_v9, %v915_v0 }
 0x1fe   :  { %v1016_v33 = vadd.bf16 %v3120_v19, %v936_v2  ;;  %v1018_v12 = vadd.bf16 %v3120_v19, %v938_v6 }
 0x1ff   :  { %v1017_v55 = vadd.bf16 %v3120_v19, %v937_v7  ;;  %v1019_v13 = vadd.bf16 %v3120_v19, %v939_v11 }
 0x200   :  { %v1032_v17 = vmax.bf16 %v2735_v8, %v1016_v33  ;;  %v1034_v14 = vmax.bf16 %v2735_v8, %v1018_v12 }
 0x201   :  { %v870_v16 = vpop.f32.mrb[44].mxu0  ;;  %v1033_v15 = vmax.bf16 %v2735_v8, %v1017_v55  ;;  %v923_v18 = vpop.f32.mrb[44].mxu1  ;;  %v1035_v21 = vmax.bf16 %v2735_v8, %v1019_v13 }
 0x202   :  { %v872_v20 = vpop.f32.mrb[45].mxu0  ;;  %v925_v22 = vpop.f32.mrb[45].mxu1 }
 0x203   :  { %v874_v23 = vpop.f32.mrb[46].mxu0  ;;  %1140 = vmatprep.subr.bf16.mxu0 %v1033_v15  ;;  %v927_v25 = vpop.f32.mrb[46].mxu1  ;;  %1183 = vmatprep.subr.bf16.mxu1 %v1035_v21 }
 0x204   :  { %v944_v24 = vpack.c.bf16 %v874_v23, %v870_v16  ;;  %v876_v26 = vpop.f32.mrb[47].mxu0  ;;  %1141 = vmatpush1.bf16.msra.mxu0 %v1032_v17  ;;  %v946_v19 = vpack.c.bf16 %v927_v25, %v923_v18  ;;  %v929_v28 = vpop.f32.mrb[47].mxu1  ;;  %1184 = vmatpush1.bf16.msra.mxu1 %v1034_v14 }
 0x205   :  { %v945_v27 = vpack.c.bf16 %v876_v26, %v872_v20  ;;  %v947_v30 = vpack.c.bf16 %v929_v28, %v925_v22  ;;  %v1542_v15 = vpop.permute.xlu1 %1541  ;;  %v1530_v17 = vpop.permute.xlu0 %1529 }
 0x206   :  { %v1024_v29 = vadd.bf16 %v3132_v44, %v944_v24  ;;  %v1026_v31 = vadd.bf16 %v3132_v44, %v946_v19  ;;  %v1550_v18 = vrot.slane %v1542_v15, %v3002_v10  ;;  %v1538_v20 = vrot.slane %v1530_v17, %v3002_v10 }
 0x207   :  { %v1025_v32 = vadd.bf16 %v3132_v44, %v945_v27  ;;  %v1027_v34 = vadd.bf16 %v3132_v44, %v947_v30 }
 0x208   :  { %v1040_v37 = vmax.bf16 %v2735_v8, %v1024_v29  ;;  %v1042_v38 = vmax.bf16 %v2735_v8, %v1026_v31  ;;  %v3195_v25 = vcombine.low %v1538_v20, %v1550_v18 }
 0x209   :  { %v1041_v35 = vmax.bf16 %v2735_v8, %v1025_v32  ;;  %v1043_v36 = vmax.bf16 %v2735_v8, %v1027_v34  ;;  %v1566_v34 = vpop.permute.xlu1 %1565 }
 0x20b   :  { %1142 = vmatprep.subr.bf16.mxu0 %v1041_v35  ;;  %1185 = vmatprep.subr.bf16.mxu1 %v1043_v36  ;;  %v1554_v35 = vpop.permute.xlu0 %1553 }
 0x20c   :  { %1143 = vmatpush1.bf16.msra.mxu0 %v1040_v37  ;;  %1186 = vmatpush1.bf16.msra.mxu1 %v1042_v38  ;;  %v1574_v38 = vrot.slane %v1566_v34, %v3002_v10  ;;  %v1562_v39 = vrot.slane %v1554_v35, %v3002_v10 }
 0x20f   :  { %2638 = vmatmul.mubr.msk.bf16.vlgmr.msra.gmra.mrb[52].mxu0 %vm170_vm0, %v2702_v5  ;;  %2639 = vmatmul.mubr.msk.bf16.vlgmr.msra.gmra.mrb[52].mxu1 %vm170_vm0, %v2702_v5  ;;  %v2703_v5 = vld [vmem:[%s3444_s7] sm:$0xff]  }
 0x210   :  { %1327 = vmatprep.mubr.bf16.mxu0 %v2735_v8  ;;  %1380 = vmatprep.mubr.bf16.mxu1 %v2735_v8 }
 0x2c2   :  { %v1088_v43 = vpop.f32.mrb[48].mxu0  ;;  %v1131_v44 = vpop.f32.mrb[48].mxu1 }
 0x2c3   :  { %v1090_v45 = vpop.f32.mrb[49].mxu0  ;;  %v1133_v46 = vpop.f32.mrb[49].mxu1 }
 0x2c4   :  { %v1092_v47 = vpop.f32.mrb[50].mxu0  ;;  %v1135_v50 = vpop.f32.mrb[50].mxu1 }
 0x2c5   :  { %v1226_v49 = vpack.c.bf16 %v1092_v47, %v1088_v43  ;;  %v1094_v51 = vpop.f32.mrb[51].mxu0  ;;  %v1228_v52 = vpack.c.bf16 %v1135_v50, %v1131_v44  ;;  %v1137_v54 = vpop.f32.mrb[51].mxu1  ;;  %v3207_v50 = vcombine.low %v1562_v39, %v1574_v38 }
 0x2c6   :  { %v1227_v53 = vpack.c.bf16 %v1094_v51, %v1090_v45  ;;  %v1229_v57 = vpack.c.bf16 %v1137_v54, %v1133_v46 }
 0x2c7   :  { %v1266_v56 = vadd.bf16 %v2640_v48, %v1226_v49  ;;  %v1268_v58 = vadd.bf16 %v2640_v48, %v1228_v52 }
 0x2c8   :  { %v1267_v59 = vadd.bf16 %v2640_v48, %v1227_v53  ;;  %v1269_v60 = vadd.bf16 %v2640_v48, %v1229_v57 }
 0x2ca   :  { %1295 = vmatprep.subr.bf16.mxu0 %v1267_v59  ;;  %1348 = vmatprep.subr.bf16.mxu1 %v1269_v60 }
 0x2cb   :  { %1296 = vmatpush1.bf16.msra.mxu0 %v1266_v56  ;;  %1349 = vmatpush1.bf16.msra.mxu1 %v1268_v58 }
 0x2ce   :  { %2643 = vmatmul.mubr.msk.bf16.vlgmr.msra.gmra.mrb[56].mxu0 %vm1288_vm2, %v2703_v5  ;;  %2645 = vmatmul.mubr.msk.bf16.vlgmr.msra.gmra.mrb[56].mxu1 %vm1288_vm2, %v2703_v5 }
 0x2cf   :  { %1337 = vmatprep.mubr.bf16.mxu0 %v2735_v8  ;;  %1390 = vmatprep.mubr.bf16.mxu1 %v2735_v8 }
 0x2d6   :  { %2644 = vmatmul.mubr.msk.bf16.gmra.mrb[60].mxu0 %vm1288_vm2, %v2704_v61  ;;  %2646 = vmatmul.mubr.msk.bf16.gmra.mrb[60].mxu1 %vm1288_vm2, %v2704_v61 }
 0x2d7   :  { %1433 = vmatprep.mubr.bf16.mxu0 %v2735_v8  ;;  %1486 = vmatprep.mubr.bf16.mxu1 %v2735_v8 }
 0x2e2   :  { %v1174_v62 = vpop.f32.mrb[52].mxu0  ;;  %v1217_v63 = vpop.f32.mrb[52].mxu1 }
 0x2e3   :  { %v1176_v0 = vpop.f32.mrb[53].mxu0  ;;  %v1219_v1 = vpop.f32.mrb[53].mxu1 }
 0x2e4   :  { %v1178_v2 = vpop.f32.mrb[54].mxu0  ;;  %v1221_v4 = vpop.f32.mrb[54].mxu1 }
 0x2e5   :  { %v1230_v3 = vpack.c.bf16 %v1178_v2, %v1174_v62  ;;  %v1180_v6 = vpop.f32.mrb[55].mxu0  ;;  %v1232_v7 = vpack.c.bf16 %v1221_v4, %v1217_v63  ;;  %v1223_v33 = vpop.f32.mrb[55].mxu1  ;;  %v3220_v2 = vld [vmem:[%s3446_s9] sm:$0xff]  }
 0x2e6   :  { %v1231_v9 = vpack.c.bf16 %v1180_v6, %v1176_v0  ;;  %v1233_v12 = vpack.c.bf16 %v1223_v33, %v1219_v1 }
 0x2e7   :  { %v1270_v11 = vadd.bf16 %v2640_v48, %v1230_v3  ;;  %v1272_v55 = vadd.bf16 %v2640_v48, %v1232_v7  ;;  %v3231_v3 = vld [vmem:[%s3446_s9 + $0x8] sm:$0xff]  }
 0x2e8   :  { %v1271_v13 = vadd.bf16 %v2640_v48, %v1231_v9  ;;  %v1273_v16 = vadd.bf16 %v2640_v48, %v1233_v12 }
 0x2ea   :  { %1401 = vmatprep.subr.bf16.mxu0 %v1271_v13  ;;  %1454 = vmatprep.subr.bf16.mxu1 %v1273_v16 }
 0x2eb   :  { %1402 = vmatpush1.bf16.msra.mxu0 %v1270_v11  ;;  %1455 = vmatpush1.bf16.msra.mxu1 %v1272_v55  ;;  %v2707_v11 = vld [vmem:[%s3446_s9 + $0x10] sm:$0xff]  }
 0x2ee   :  { %2647 = vmatmul.mubr.msk.bf16.vlgmr.msra.gmra.mrb[64].mxu0 %vm1288_vm2, %v2703_v5  ;;  %2649 = vmatmul.mubr.msk.bf16.vlgmr.msra.gmra.mrb[64].mxu1 %vm1288_vm2, %v2703_v5 }
 0x2ef   :  { %1443 = vmatprep.mubr.bf16.mxu0 %v2735_v8  ;;  %1496 = vmatprep.mubr.bf16.mxu1 %v2735_v8 }
 0x2f6   :  { %2648 = vmatmul.mubr.msk.bf16.gmra.mrb[68].mxu0 %vm1288_vm2, %v2704_v61  ;;  %2650 = vmatmul.mubr.msk.bf16.gmra.mrb[68].mxu1 %vm1288_vm2, %v2704_v61 }
 0x2f7   :  { %1691 = vmatprep.mubr.bf16.mxu0 %v2735_v8  ;;  %1764 = vmatprep.mubr.bf16.mxu1 %v2735_v8 }
 0x3a1   :  { %v1329_v21 = vpop.f32.mrb[56].mxu0  ;;  %v1382_v14 = vpop.f32.mrb[56].mxu1 }
 0x3a2   :  { %v1331_v22 = vpop.f32.mrb[57].mxu0  ;;  %v1384_v23 = vpop.f32.mrb[57].mxu1 }
 0x3a3   :  { %v1333_v24 = vpop.f32.mrb[58].mxu0  ;;  %v1386_v19 = vpop.f32.mrb[58].mxu1 }
 0x3a4   :  { %v1507_v26 = vpack.c.bf16 %v1333_v24, %v1329_v21  ;;  %v1335_v27 = vpop.f32.mrb[59].mxu0  ;;  %v1509_v28 = vpack.c.bf16 %v1386_v19, %v1382_v14  ;;  %v1388_v30 = vpop.f32.mrb[59].mxu1 }
 0x3a5   :  { %v1508_v29 = vpack.c.bf16 %v1335_v27, %v1331_v22  ;;  %v1510_v32 = vpack.c.bf16 %v1388_v30, %v1384_v23 }
 0x3a6   :  { %v1587_v31 = vadd.bf16 %v3195_v25, %v1507_v26  ;;  %v1589_v37 = vadd.bf16 %v3195_v25, %v1509_v28 }
 0x3a7   :  { %v1588_v36 = vadd.bf16 %v3195_v25, %v1508_v29  ;;  %v1590_v40 = vadd.bf16 %v3195_v25, %v1510_v32 }
 0x3a8   :  { %v1603_v43 = vmax.bf16 %v2735_v8, %v1587_v31  ;;  %v1605_v47 = vmax.bf16 %v2735_v8, %v1589_v37 }
 0x3a9   :  { %v1339_v41 = vpop.f32.mrb[60].mxu0  ;;  %v1604_v42 = vmax.bf16 %v2735_v8, %v1588_v36  ;;  %v1392_v44 = vpop.f32.mrb[60].mxu1  ;;  %v1606_v46 = vmax.bf16 %v2735_v8, %v1590_v40 }
 0x3aa   :  { %v1341_v45 = vpop.f32.mrb[61].mxu0  ;;  %v1394_v48 = vpop.f32.mrb[61].mxu1 }
 0x3ab   :  { %v1343_v49 = vpop.f32.mrb[62].mxu0  ;;  %1659 = vmatprep.subr.bf16.mxu0 %v1604_v42  ;;  %v1396_v52 = vpop.f32.mrb[62].mxu1  ;;  %1732 = vmatprep.subr.bf16.mxu1 %v1606_v46 }
 0x3ac   :  { %v1515_v51 = vpack.c.bf16 %v1343_v49, %v1339_v41  ;;  %v1345_v53 = vpop.f32.mrb[63].mxu0  ;;  %1660 = vmatpush1.bf16.msra.mxu0 %v1603_v43  ;;  %v1517_v54 = vpack.c.bf16 %v1396_v52, %v1392_v44  ;;  %v1398_v57 = vpop.f32.mrb[63].mxu1  ;;  %1733 = vmatpush1.bf16.msra.mxu1 %v1605_v47 }
 0x3ad   :  { %v1516_v56 = vpack.c.bf16 %v1345_v53, %v1341_v45  ;;  %v1518_v59 = vpack.c.bf16 %v1398_v57, %v1394_v48  ;;  %v2006_v48 = vpop.permute.xlu1 %2005  ;;  %v1994_v49 = vpop.permute.xlu0 %1993 }
 0x3ae   :  { %v1595_v58 = vadd.bf16 %v3207_v50, %v1515_v51  ;;  %v1597_v60 = vadd.bf16 %v3207_v50, %v1517_v54  ;;  %v2002_v51 = vrot.slane %v1994_v49, %v3002_v10 }
 0x3af   :  { %v1596_v5 = vadd.bf16 %v3207_v50, %v1516_v56  ;;  %v1598_v61 = vadd.bf16 %v3207_v50, %v1518_v59 }
 0x3b0   :  { %v1611_v63 = vmax.bf16 %v2735_v8, %v1595_v58  ;;  %v1613_v1 = vmax.bf16 %v2735_v8, %v1597_v60 }
 0x3b1   :  { %v1612_v62 = vmax.bf16 %v2735_v8, %v1596_v5  ;;  %v1614_v0 = vmax.bf16 %v2735_v8, %v1598_v61 }
 0x3b3   :  { %1661 = vmatprep.subr.bf16.mxu0 %v1612_v62  ;;  %1734 = vmatprep.subr.bf16.mxu1 %v1614_v0 }
 0x3b4   :  { %1662 = vmatpush1.bf16.msra.mxu0 %v1611_v63  ;;  %1735 = vmatpush1.bf16.msra.mxu1 %v1613_v1 }
 0x3b7   :  { %2657 = vmatmul.mubr.msk.bf16.vlgmr.msra.gmra.mrb[72].mxu0 %vm170_vm0, %v3220_v2  ;;  %2661 = vmatmul.mubr.msk.bf16.vlgmr.msra.gmra.mrb[72].mxu1 %vm170_vm0, %v3220_v2 }
 0x3b8   :  { %1701 = vmatprep.mubr.bf16.mxu0 %v2735_v8  ;;  %1774 = vmatprep.mubr.bf16.mxu1 %v2735_v8 }
 0x3bf   :  { %2658 = vmatmul.mubr.msk.bf16.gmra.mrb[76].mxu0 %vm170_vm0, %v3231_v3  ;;  %2662 = vmatmul.mubr.msk.bf16.gmra.mrb[76].mxu1 %vm170_vm0, %v3231_v3 }
 0x3c0   :  { %1711 = vmatprep.mubr.bf16.mxu0 %v2735_v8  ;;  %1784 = vmatprep.mubr.bf16.mxu1 %v2735_v8 }
 0x3c1   :  { %v1435_v4 = vpop.f32.mrb[64].mxu0  ;;  %v1488_v6 = vpop.f32.mrb[64].mxu1 }
 0x3c2   :  { %v1437_v7 = vpop.f32.mrb[65].mxu0  ;;  %v1490_v9 = vpop.f32.mrb[65].mxu1 }
 0x3c3   :  { %v1439_v33 = vpop.f32.mrb[66].mxu0  ;;  %v1492_v55 = vpop.f32.mrb[66].mxu1 }
 0x3c4   :  { %v1511_v12 = vpack.c.bf16 %v1439_v33, %v1435_v4  ;;  %v1441_v13 = vpop.f32.mrb[67].mxu0  ;;  %v1513_v16 = vpack.c.bf16 %v1492_v55, %v1488_v6  ;;  %v1494_v17 = vpop.f32.mrb[67].mxu1 }
 0x3c5   :  { %v1512_v15 = vpack.c.bf16 %v1441_v13, %v1437_v7  ;;  %v1514_v20 = vpack.c.bf16 %v1494_v17, %v1490_v9 }
 0x3c6   :  { %v1591_v18 = vadd.bf16 %v3195_v25, %v1511_v12  ;;  %v1593_v21 = vadd.bf16 %v3195_v25, %v1513_v16 }
 0x3c7   :  { %v1592_v14 = vadd.bf16 %v3195_v25, %v1512_v15  ;;  %2659 = vmatmul.mubr.msk.bf16.gmra.mrb[80].mxu0 %vm170_vm0, %v2707_v11  ;;  %v1594_v22 = vadd.bf16 %v3195_v25, %v1514_v20  ;;  %2663 = vmatmul.mubr.msk.bf16.gmra.mrb[80].mxu1 %vm170_vm0, %v2707_v11  ;;  %v2708_v25 = vld [vmem:[%s3446_s9 + $0x18] sm:$0xff]  }
 0x3c8   :  { %1721 = vmatprep.mubr.bf16.mxu0 %v2735_v8  ;;  %1794 = vmatprep.mubr.bf16.mxu1 %v2735_v8  ;;  %v1607_v26 = vmax.bf16 %v2735_v8, %v1591_v18  ;;  %v1609_v29 = vmax.bf16 %v2735_v8, %v1593_v21 }
 0x3c9   :  { %v1445_v23 = vpop.f32.mrb[68].mxu0  ;;  %v1608_v24 = vmax.bf16 %v2735_v8, %v1592_v14  ;;  %v1498_v19 = vpop.f32.mrb[68].mxu1  ;;  %v1610_v28 = vmax.bf16 %v2735_v8, %v1594_v22 }
 0x3ca   :  { %v1447_v27 = vpop.f32.mrb[69].mxu0  ;;  %v1500_v30 = vpop.f32.mrb[69].mxu1 }
 0x3cb   :  { %v1449_v31 = vpop.f32.mrb[70].mxu0  ;;  %1805 = vmatprep.subr.bf16.mxu0 %v1608_v24  ;;  %v1502_v34 = vpop.f32.mrb[70].mxu1  ;;  %1878 = vmatprep.subr.bf16.mxu1 %v1610_v28 }
 0x3cc   :  { %v1519_v32 = vpack.c.bf16 %v1449_v31, %v1445_v23  ;;  %v1451_v35 = vpop.f32.mrb[71].mxu0  ;;  %1806 = vmatpush1.bf16.msra.mxu0 %v1607_v26  ;;  %v1521_v37 = vpack.c.bf16 %v1502_v34, %v1498_v19  ;;  %v1504_v38 = vpop.f32.mrb[71].mxu1  ;;  %1879 = vmatpush1.bf16.msra.mxu1 %v1609_v29 }
 0x3cd   :  { %v1520_v36 = vpack.c.bf16 %v1451_v35, %v1447_v27  ;;  %v1522_v40 = vpack.c.bf16 %v1504_v38, %v1500_v30 }
 0x3ce   :  { %v1599_v39 = vadd.bf16 %v3207_v50, %v1519_v32  ;;  %v1601_v41 = vadd.bf16 %v3207_v50, %v1521_v37 }
 0x3cf   :  { %v1600_v42 = vadd.bf16 %v3207_v50, %v1520_v36  ;;  %2660 = vmatmul.mubr.msk.bf16.gmra.mrb[84].mxu0 %vm170_vm0, %v2708_v25  ;;  %v1602_v43 = vadd.bf16 %v3207_v50, %v1522_v40  ;;  %2664 = vmatmul.mubr.msk.bf16.gmra.mrb[84].mxu1 %vm170_vm0, %v2708_v25  ;;  %v2014_v50 = vrot.slane %v2006_v48, %v3002_v10 }
 0x3d0   :  { %1837 = vmatprep.mubr.bf16.mxu0 %v2735_v8  ;;  %1910 = vmatprep.mubr.bf16.mxu1 %v2735_v8  ;;  %v1615_v45 = vmax.bf16 %v2735_v8, %v1599_v39  ;;  %v1617_v47 = vmax.bf16 %v2735_v8, %v1601_v41 }
 0x3d1   :  { %v1616_v44 = vmax.bf16 %v2735_v8, %v1600_v42  ;;  %v1618_v46 = vmax.bf16 %v2735_v8, %v1602_v43  ;;  %v3291_v58 = vcombine.low %v2002_v51, %v2014_v50 }
 0x3d3   :  { %1807 = vmatprep.subr.bf16.mxu0 %v1616_v44  ;;  %1880 = vmatprep.subr.bf16.mxu1 %v1618_v46 }
 0x3d4   :  { %1808 = vmatpush1.bf16.msra.mxu0 %v1615_v45  ;;  %1881 = vmatpush1.bf16.msra.mxu1 %v1617_v47 }
 0x3d7   :  { %2665 = vmatmul.mubr.msk.bf16.vlgmr.msra.gmra.mrb[88].mxu0 %vm170_vm0, %v3220_v2  ;;  %2669 = vmatmul.mubr.msk.bf16.vlgmr.msra.gmra.mrb[88].mxu1 %vm170_vm0, %v3220_v2  ;;  %v2030_v2 = vpop.permute.xlu1 %2029 }
 0x3d8   :  { %1847 = vmatprep.mubr.bf16.mxu0 %v2735_v8  ;;  %1920 = vmatprep.mubr.bf16.mxu1 %v2735_v8  ;;  %v2038_v7 = vrot.slane %v2030_v2, %v3002_v10 }
 0x3db   :  { %v2054_v29 = vpop.permute.xlu1 %2053 }
 0x3dc   :  { %v2062_v32 = vrot.slane %v2054_v29, %v3002_v10 }
 0x3df   :  { %2666 = vmatmul.mubr.msk.bf16.gmra.mrb[92].mxu0 %vm170_vm0, %v3231_v3  ;;  %2670 = vmatmul.mubr.msk.bf16.gmra.mrb[92].mxu1 %vm170_vm0, %v3231_v3  ;;  %v2018_v3 = vpop.permute.xlu0 %2017 }
 0x3e0   :  { %1857 = vmatprep.mubr.bf16.mxu0 %v2735_v8  ;;  %1930 = vmatprep.mubr.bf16.mxu1 %v2735_v8  ;;  %v2026_v9 = vrot.slane %v2018_v3, %v3002_v10 }
 0x3e2   :  { %v3303_v21 = vcombine.low %v2026_v9, %v2038_v7 }
 0x3e3   :  { %v2042_v30 = vpop.permute.xlu0 %2041 }
 0x3e4   :  { %v2050_v34 = vrot.slane %v2042_v30, %v3002_v10 }
 0x3e6   :  { %v3315_v45 = vcombine.low %v2050_v34, %v2062_v32 }
 0x3e7   :  { %2667 = vmatmul.mubr.msk.bf16.gmra.mrb[96].mxu0 %vm170_vm0, %v2707_v11  ;;  %2671 = vmatmul.mubr.msk.bf16.gmra.mrb[96].mxu1 %vm170_vm0, %v2707_v11 }
 0x3e8   :  { %1867 = vmatprep.mubr.bf16.mxu0 %v2735_v8  ;;  %1940 = vmatprep.mubr.bf16.mxu1 %v2735_v8 }
 0x3ef   :  { %2668 = vmatmul.mubr.msk.bf16.gmra.mrb[100].mxu0 %vm170_vm0, %v2708_v25  ;;  %2672 = vmatmul.mubr.msk.bf16.gmra.mrb[100].mxu1 %vm170_vm0, %v2708_v25 }
 0x3f0   :  { %2227 = vmatprep.mubr.bf16.mxu0 %v2735_v8  ;;  %2280 = vmatprep.mubr.bf16.mxu1 %v2735_v8 }
 0x48a   :  { %v1693_v52 = vpop.f32.mrb[72].mxu0  ;;  %v1766_v53 = vpop.f32.mrb[72].mxu1 }
 0x48b   :  { %v1695_v54 = vpop.f32.mrb[73].mxu0  ;;  %v1768_v56 = vpop.f32.mrb[73].mxu1 }
 0x48c   :  { %v1697_v57 = vpop.f32.mrb[74].mxu0  ;;  %v1770_v60 = vpop.f32.mrb[74].mxu1 }
 0x48d   :  { %v1951_v59 = vpack.c.bf16 %v1697_v57, %v1693_v52  ;;  %v1699_v5 = vpop.f32.mrb[75].mxu0  ;;  %v1953_v61 = vpack.c.bf16 %v1770_v60, %v1766_v53  ;;  %v1772_v63 = vpop.f32.mrb[75].mxu1 }
 0x48e   :  { %v1952_v62 = vpack.c.bf16 %v1699_v5, %v1695_v54  ;;  %v1954_v1 = vpack.c.bf16 %v1772_v63, %v1768_v56  ;;  %v2078_v54 = vpop.permute.xlu1 %2077  ;;  %v2066_v56 = vpop.permute.xlu0 %2065 }
 0x48f   :  { %v2111_v0 = vadd.bf16 %v3291_v58, %v1951_v59  ;;  %v2113_v4 = vadd.bf16 %v3291_v58, %v1953_v61  ;;  %v2086_v60 = vrot.slane %v2078_v54, %v3002_v10  ;;  %v2074_v5 = vrot.slane %v2066_v56, %v3002_v10 }
 0x490   :  { %v2112_v6 = vadd.bf16 %v3291_v58, %v1952_v62  ;;  %v2114_v33 = vadd.bf16 %v3291_v58, %v1954_v1 }
 0x491   :  { %v2143_v55 = vmax.bf16 %v2735_v8, %v2111_v0  ;;  %v2145_v17 = vmax.bf16 %v2735_v8, %v2113_v4  ;;  %v3327_v9 = vcombine.low %v2074_v5, %v2086_v60 }
 0x492   :  { %v1703_v11 = vpop.f32.mrb[76].mxu0  ;;  %v2144_v12 = vmax.bf16 %v2735_v8, %v2112_v6  ;;  %v1776_v13 = vpop.f32.mrb[76].mxu1  ;;  %v2146_v15 = vmax.bf16 %v2735_v8, %v2114_v33 }
 0x493   :  { %v1705_v16 = vpop.f32.mrb[77].mxu0  ;;  %v1778_v18 = vpop.f32.mrb[77].mxu1 }
 0x494   :  { %v1707_v20 = vpop.f32.mrb[78].mxu0  ;;  %2195 = vmatprep.subr.bf16.mxu0 %v2144_v12  ;;  %v1780_v22 = vpop.f32.mrb[78].mxu1  ;;  %2248 = vmatprep.subr.bf16.mxu1 %v2146_v15 }
 0x495   :  { %v1959_v14 = vpack.c.bf16 %v1707_v20, %v1703_v11  ;;  %v1709_v23 = vpop.f32.mrb[79].mxu0  ;;  %2196 = vmatpush1.bf16.msra.mxu0 %v2143_v55  ;;  %v1961_v24 = vpack.c.bf16 %v1780_v22, %v1776_v13  ;;  %v1782_v19 = vpop.f32.mrb[79].mxu1  ;;  %2249 = vmatpush1.bf16.msra.mxu1 %v2145_v17 }
 0x496   :  { %v1960_v26 = vpack.c.bf16 %v1709_v23, %v1705_v16  ;;  %v1962_v28 = vpack.c.bf16 %v1782_v19, %v1778_v18 }
 0x497   :  { %v2119_v27 = vadd.bf16 %v3303_v21, %v1959_v14  ;;  %v2121_v31 = vadd.bf16 %v3303_v21, %v1961_v24 }
 0x498   :  { %v2120_v25 = vadd.bf16 %v3303_v21, %v1960_v26  ;;  %v2122_v35 = vadd.bf16 %v3303_v21, %v1962_v28 }
 0x499   :  { %v2151_v38 = vmax.bf16 %v2735_v8, %v2119_v27  ;;  %v2153_v42 = vmax.bf16 %v2735_v8, %v2121_v31  ;;  %v3340_v31 = vld [vmem:[%s3448_s11] sm:$0xff]  }
 0x49a   :  { %v1713_v37 = vpop.f32.mrb[80].mxu0  ;;  %v2152_v36 = vmax.bf16 %v2735_v8, %v2120_v25  ;;  %v1786_v39 = vpop.f32.mrb[80].mxu1  ;;  %v2154_v41 = vmax.bf16 %v2735_v8, %v2122_v35 }
 0x49b   :  { %v1715_v40 = vpop.f32.mrb[81].mxu0  ;;  %v1788_v43 = vpop.f32.mrb[81].mxu1 }
 0x49c   :  { %v1717_v44 = vpop.f32.mrb[82].mxu0  ;;  %2197 = vmatprep.subr.bf16.mxu0 %v2152_v36  ;;  %v1790_v47 = vpop.f32.mrb[82].mxu1  ;;  %2250 = vmatprep.subr.bf16.mxu1 %v2154_v41 }
 0x49d   :  { %v1967_v46 = vpack.c.bf16 %v1717_v44, %v1713_v37  ;;  %v1719_v48 = vpop.f32.mrb[83].mxu0  ;;  %2198 = vmatpush1.bf16.msra.mxu0 %v2151_v38  ;;  %v1969_v49 = vpack.c.bf16 %v1790_v47, %v1786_v39  ;;  %v1792_v51 = vpop.f32.mrb[83].mxu1  ;;  %2251 = vmatpush1.bf16.msra.mxu1 %v2153_v42 }
 0x49e   :  { %v1968_v50 = vpack.c.bf16 %v1719_v48, %v1715_v40  ;;  %v1970_v53 = vpack.c.bf16 %v1792_v51, %v1788_v43 }
 0x49f   :  { %v2127_v52 = vadd.bf16 %v3315_v45, %v1967_v46  ;;  %v2129_v57 = vadd.bf16 %v3315_v45, %v1969_v49 }
 0x4a0   :  { %v2128_v59 = vadd.bf16 %v3315_v45, %v1968_v50  ;;  %v2130_v61 = vadd.bf16 %v3315_v45, %v1970_v53 }
 0x4a1   :  { %v2159_v0 = vmax.bf16 %v2735_v8, %v2127_v52  ;;  %v2161_v4 = vmax.bf16 %v2735_v8, %v2129_v57  ;;  %v3359_v52 = vld [vmem:[%s3448_s11 + $0x8] sm:$0xff]   ;;  %s2737_s11 = smov [#allocation2]  }
 0x4a2   :  { %v1723_v62 = vpop.f32.mrb[84].mxu0  ;;  %v2160_v63 = vmax.bf16 %v2735_v8, %v2128_v59  ;;  %v1796_v1 = vpop.f32.mrb[84].mxu1  ;;  %v2162_v3 = vmax.bf16 %v2735_v8, %v2130_v61  ;;  %s2572_s1 = sshll.u32 %s2737_s11, 4  ;;  %s2573_s1 = int_to_ptr.vmem [resolvable:$true] %s2572_s1 }
 0x4a3   :  { %v1725_v2 = vpop.f32.mrb[85].mxu0  ;;  %v1798_v6 = vpop.f32.mrb[85].mxu1  ;;  %s2711_s23 = scalar_lea.vmem %s2573_s1, 4096  ;;  %p2716_p1 = scmp.lt.s32.totalorder %s2573_s1, %s2573_s1 }
 0x4a4   :  { %v1727_v7 = vpop.f32.mrb[86].mxu0  ;;  %2199 = vmatprep.subr.bf16.mxu0 %v2160_v63  ;;  %v1800_v11 = vpop.f32.mrb[86].mxu1  ;;  %2252 = vmatprep.subr.bf16.mxu1 %v2162_v3  ;;  %p2712_p0 = scmp.ne.s32.totalorder %s2573_s1, %s2711_s23  ;;  %p2717_p2 = scmp.lt.s32.totalorder %s2711_s23, %s2711_s23 }
 0x4a5   :  { %v1975_v33 = vpack.c.bf16 %v1727_v7, %v1723_v62  ;;  %v1729_v12 = vpop.f32.mrb[87].mxu0  ;;  %2200 = vmatpush1.bf16.msra.mxu0 %v2159_v0  ;;  %v1977_v55 = vpack.c.bf16 %v1800_v11, %v1796_v1  ;;  %v1802_v16 = vpop.f32.mrb[87].mxu1  ;;  %2253 = vmatpush1.bf16.msra.mxu1 %v2161_v4 }
 0x4a6   :  { %v1976_v13 = vpack.c.bf16 %v1729_v12, %v1725_v2  ;;  %v1978_v17 = vpack.c.bf16 %v1802_v16, %v1798_v6  ;;  %p2718_p3 = por %p2717_p2, %p2716_p1 }
 0x4a7   :  { %v2135_v15 = vadd.bf16 %v3327_v9, %v1975_v33  ;;  %v2137_v18 = vadd.bf16 %v3327_v9, %v1977_v55 }
 0x4a8   :  { %v2136_v20 = vadd.bf16 %v3327_v9, %v1976_v13  ;;  %v2138_v14 = vadd.bf16 %v3327_v9, %v1978_v17  ;;  %p2719_p4 = pnand %p2718_p3, %p2712_p0 }
 0x4a9   :  { %v2167_v24 = vmax.bf16 %v2735_v8, %v2135_v15  ;;  %v2169_v28 = vmax.bf16 %v2735_v8, %v2137_v18 }
 0x4aa   :  { %v1839_v22 = vpop.f32.mrb[88].mxu0  ;;  %v2168_v23 = vmax.bf16 %v2735_v8, %v2136_v20  ;;  %v1912_v26 = vpop.f32.mrb[88].mxu1  ;;  %v2170_v27 = vmax.bf16 %v2735_v8, %v2138_v14 }
 0x4ab   :  { %v1841_v19 = vpop.f32.mrb[89].mxu0  ;;  %v1914_v29 = vpop.f32.mrb[89].mxu1 }
 0x4ac   :  { %v1843_v30 = vpop.f32.mrb[90].mxu0  ;;  %2201 = vmatprep.subr.bf16.mxu0 %v2168_v23  ;;  %v1916_v32 = vpop.f32.mrb[90].mxu1  ;;  %2254 = vmatprep.subr.bf16.mxu1 %v2170_v27 }
 0x4ad   :  { %v1955_v25 = vpack.c.bf16 %v1843_v30, %v1839_v22  ;;  %v1845_v34 = vpop.f32.mrb[91].mxu0  ;;  %2202 = vmatpush1.bf16.msra.mxu0 %v2167_v24  ;;  %v1957_v35 = vpack.c.bf16 %v1916_v32, %v1912_v26  ;;  %v1918_v36 = vpop.f32.mrb[91].mxu1  ;;  %2255 = vmatpush1.bf16.msra.mxu1 %v2169_v28 }
 0x4ae   :  { %v1956_v37 = vpack.c.bf16 %v1845_v34, %v1841_v19  ;;  %v1958_v39 = vpack.c.bf16 %v1918_v36, %v1914_v29 }
 0x4af   :  { %v2115_v38 = vadd.bf16 %v3291_v58, %v1955_v25  ;;  %v2117_v40 = vadd.bf16 %v3291_v58, %v1957_v35 }
 0x4b0   :  { %v2116_v41 = vadd.bf16 %v3291_v58, %v1956_v37  ;;  %2679 = vmatmul.mubr.msk.bf16.vlgmr.msra.gmra.mrb[104].mxu0 %vm713_vm1, %v3340_v31  ;;  %v2118_v42 = vadd.bf16 %v3291_v58, %v1958_v39  ;;  %2681 = vmatmul.mubr.msk.bf16.vlgmr.msra.gmra.mrb[104].mxu1 %vm713_vm1, %v3340_v31 }
 0x4b1   :  { %2237 = vmatprep.mubr.bf16.mxu0 %v2735_v8  ;;  %2290 = vmatprep.mubr.bf16.mxu1 %v2735_v8  ;;  %v2147_v46 = vmax.bf16 %v2735_v8, %v2115_v38  ;;  %v2149_v50 = vmax.bf16 %v2735_v8, %v2117_v40 }
 0x4b2   :  { %v1849_v43 = vpop.f32.mrb[92].mxu0  ;;  %v2148_v44 = vmax.bf16 %v2735_v8, %v2116_v41  ;;  %v1922_v47 = vpop.f32.mrb[92].mxu1  ;;  %v2150_v49 = vmax.bf16 %v2735_v8, %v2118_v42 }
 0x4b3   :  { %v1851_v48 = vpop.f32.mrb[93].mxu0  ;;  %v1924_v51 = vpop.f32.mrb[93].mxu1 }
 0x4b4   :  { %v1853_v58 = vpop.f32.mrb[94].mxu0  ;;  %2301 = vmatprep.subr.bf16.mxu0 %v2148_v44  ;;  %v1926_v54 = vpop.f32.mrb[94].mxu1  ;;  %2354 = vmatprep.subr.bf16.mxu1 %v2150_v49 }
 0x4b5   :  { %v1963_v53 = vpack.c.bf16 %v1853_v58, %v1849_v43  ;;  %v1855_v56 = vpop.f32.mrb[95].mxu0  ;;  %2302 = vmatpush1.bf16.msra.mxu0 %v2147_v46  ;;  %v1965_v57 = vpack.c.bf16 %v1926_v54, %v1922_v47  ;;  %v1928_v60 = vpop.f32.mrb[95].mxu1  ;;  %2355 = vmatpush1.bf16.msra.mxu1 %v2149_v50 }
 0x4b6   :  { %v1964_v59 = vpack.c.bf16 %v1855_v56, %v1851_v48  ;;  %v1966_v61 = vpack.c.bf16 %v1928_v60, %v1924_v51  ;;  %v2430_v49 = vpop.permute.xlu0 %2429 }
 0x4b7   :  { %v2123_v5 = vadd.bf16 %v3303_v21, %v1963_v53  ;;  %v2125_v62 = vadd.bf16 %v3303_v21, %v1965_v57  ;;  %v2438_v51 = vrot.slane %v2430_v49, %v3002_v10 }
 0x4b8   :  { %v2124_v63 = vadd.bf16 %v3303_v21, %v1964_v59  ;;  %2680 = vmatmul.mubr.msk.bf16.gmra.mrb[108].mxu0 %vm713_vm1, %v3359_v52  ;;  %v2126_v0 = vadd.bf16 %v3303_v21, %v1966_v61  ;;  %2682 = vmatmul.mubr.msk.bf16.gmra.mrb[108].mxu1 %vm713_vm1, %v3359_v52 }
 0x4b9   :  { %2333 = vmatprep.mubr.bf16.mxu0 %v2735_v8  ;;  %2386 = vmatprep.mubr.bf16.mxu1 %v2735_v8  ;;  %v2155_v3 = vmax.bf16 %v2735_v8, %v2123_v5  ;;  %v2157_v33 = vmax.bf16 %v2735_v8, %v2125_v62 }
 0x4ba   :  { %v1859_v1 = vpop.f32.mrb[96].mxu0  ;;  %v2156_v2 = vmax.bf16 %v2735_v8, %v2124_v63  ;;  %v1932_v4 = vpop.f32.mrb[96].mxu1  ;;  %v2158_v7 = vmax.bf16 %v2735_v8, %v2126_v0 }
 0x4bb   :  { %v1861_v6 = vpop.f32.mrb[97].mxu0  ;;  %v1934_v11 = vpop.f32.mrb[97].mxu1 }
 0x4bc   :  { %v1863_v21 = vpop.f32.mrb[98].mxu0  ;;  %2303 = vmatprep.subr.bf16.mxu0 %v2156_v2  ;;  %v1936_v55 = vpop.f32.mrb[98].mxu1  ;;  %2356 = vmatprep.subr.bf16.mxu1 %v2158_v7 }
 0x4bd   :  { %v1971_v12 = vpack.c.bf16 %v1863_v21, %v1859_v1  ;;  %v1865_v13 = vpop.f32.mrb[99].mxu0  ;;  %2304 = vmatpush1.bf16.msra.mxu0 %v2155_v3  ;;  %v1973_v16 = vpack.c.bf16 %v1936_v55, %v1932_v4  ;;  %v1938_v17 = vpop.f32.mrb[99].mxu1  ;;  %2357 = vmatpush1.bf16.msra.mxu1 %v2157_v33 }
 0x4be   :  { %v1972_v15 = vpack.c.bf16 %v1865_v13, %v1861_v6  ;;  %v1974_v20 = vpack.c.bf16 %v1938_v17, %v1934_v11  ;;  %v2454_v61 = vpop.permute.xlu0 %2453 }
 0x4bf   :  { %v2131_v18 = vadd.bf16 %v3315_v45, %v1971_v12  ;;  %v2133_v14 = vadd.bf16 %v3315_v45, %v1973_v16  ;;  %v2462_v6 = vrot.slane %v2454_v61, %v3002_v10 }
 0x4c0   :  { %v2132_v22 = vadd.bf16 %v3315_v45, %v1972_v15  ;;  %v2134_v23 = vadd.bf16 %v3315_v45, %v1974_v20 }
 0x4c1   :  { %v2163_v19 = vmax.bf16 %v2735_v8, %v2131_v18  ;;  %v2165_v30 = vmax.bf16 %v2735_v8, %v2133_v14 }
 0x4c2   :  { %v1869_v24 = vpop.f32.mrb[100].mxu0  ;;  %v2164_v26 = vmax.bf16 %v2735_v8, %v2132_v22  ;;  %v1942_v27 = vpop.f32.mrb[100].mxu1  ;;  %v2166_v29 = vmax.bf16 %v2735_v8, %v2134_v23 }
 0x4c3   :  { %v1871_v28 = vpop.f32.mrb[101].mxu0  ;;  %v1944_v25 = vpop.f32.mrb[101].mxu1 }
 0x4c4   :  { %v1873_v32 = vpop.f32.mrb[102].mxu0  ;;  %2305 = vmatprep.subr.bf16.mxu0 %v2164_v26  ;;  %v1946_v35 = vpop.f32.mrb[102].mxu1  ;;  %2358 = vmatprep.subr.bf16.mxu1 %v2166_v29 }
 0x4c5   :  { %v1979_v34 = vpack.c.bf16 %v1873_v32, %v1869_v24  ;;  %v1875_v37 = vpop.f32.mrb[103].mxu0  ;;  %2306 = vmatpush1.bf16.msra.mxu0 %v2163_v19  ;;  %v1981_v45 = vpack.c.bf16 %v1946_v35, %v1942_v27  ;;  %v1948_v38 = vpop.f32.mrb[103].mxu1  ;;  %2359 = vmatpush1.bf16.msra.mxu1 %v2165_v30 }
 0x4c6   :  { %v1980_v36 = vpack.c.bf16 %v1875_v37, %v1871_v28  ;;  %v1982_v40 = vpack.c.bf16 %v1948_v38, %v1944_v25 }
 0x4c7   :  { %v2139_v39 = vadd.bf16 %v3327_v9, %v1979_v34  ;;  %v2141_v41 = vadd.bf16 %v3327_v9, %v1981_v45 }
 0x4c8   :  { %v2140_v42 = vadd.bf16 %v3327_v9, %v1980_v36  ;;  %v2142_v43 = vadd.bf16 %v3327_v9, %v1982_v40  ;;  %v2442_v9 = vpop.permute.xlu1 %2441 }
 0x4c9   :  { %v2171_v46 = vmax.bf16 %v2735_v8, %v2139_v39  ;;  %v2173_v48 = vmax.bf16 %v2735_v8, %v2141_v41  ;;  %v2450_v50 = vrot.slane %v2442_v9, %v3002_v10 }
 0x4ca   :  { %v2172_v44 = vmax.bf16 %v2735_v8, %v2140_v42  ;;  %v2174_v47 = vmax.bf16 %v2735_v8, %v2142_v43 }
 0x4cb   :  { %v3403_v59 = vcombine.low %v2438_v51, %v2450_v50 }
 0x4cc   :  { %2307 = vmatprep.subr.bf16.mxu0 %v2172_v44  ;;  %2360 = vmatprep.subr.bf16.mxu1 %v2174_v47  ;;  %v2466_v58 = vpop.permute.xlu1 %2465 }
 0x4cd   :  { %2308 = vmatpush1.bf16.msra.mxu0 %v2171_v46  ;;  %2361 = vmatpush1.bf16.msra.mxu1 %v2173_v48  ;;  %v2474_v2 = vrot.slane %v2466_v58, %v3002_v10 }
 0x4cf   :  { %v3411_v22 = vcombine.low %v2462_v6, %v2474_v2 }
 0x4d0   :  { %2683 = vmatmul.mubr.msk.bf16.vlgmr.msra.gmra.mrb[112].mxu0 %vm713_vm1, %v3340_v31  ;;  %2685 = vmatmul.mubr.msk.bf16.vlgmr.msra.gmra.mrb[112].mxu1 %vm713_vm1, %v3340_v31 }
 0x4d1   :  { %2343 = vmatprep.mubr.bf16.mxu0 %v2735_v8  ;;  %2396 = vmatprep.mubr.bf16.mxu1 %v2735_v8 }
 0x4d8   :  { %2684 = vmatmul.mubr.msk.bf16.gmra.mrb[116].mxu0 %vm713_vm1, %v3359_v52  ;;  %2686 = vmatmul.mubr.msk.bf16.gmra.mrb[116].mxu1 %vm713_vm1, %v3359_v52 }
 0x583   :  { %v2229_v53 = vpop.f32.mrb[104].mxu0  ;;  %v2282_v54 = vpop.f32.mrb[104].mxu1 }
 0x584   :  { %v2231_v31 = vpop.f32.mrb[105].mxu0  ;;  %v2284_v56 = vpop.f32.mrb[105].mxu1 }
 0x585   :  { %v2233_v57 = vpop.f32.mrb[106].mxu0  ;;  %v2286_v60 = vpop.f32.mrb[106].mxu1 }
 0x586   :  { %v2407_v8 = vpack.c.bf16 %v2233_v57, %v2229_v53  ;;  %v2235_v5 = vpop.f32.mrb[107].mxu0  ;;  %v2409_v62 = vpack.c.bf16 %v2286_v60, %v2282_v54  ;;  %v2288_v63 = vpop.f32.mrb[107].mxu1 }
 0x587   :  { %v2408_v52 = vpack.c.bf16 %v2235_v5, %v2231_v31  ;;  %v2410_v1 = vpack.c.bf16 %v2288_v63, %v2284_v56 }
 0x588   :  { %v2487_v0 = vadd.bf16 %v3403_v59, %v2407_v8  ;;  %v2489_v3 = vadd.bf16 %v3403_v59, %v2409_v62 }
 0x589   :  { %v2488_v4 = vadd.bf16 %v3403_v59, %v2408_v52  ;;  %v2490_v11 = vadd.bf16 %v3403_v59, %v2410_v1 }
 0x58a   :  { %v2503_v7 = vunpack.c.l.bf16 %v2487_v0  ;;  %v2511_v33 = vunpack.c.h.bf16 %v2487_v0  ;;  %v2505_v21 = vunpack.c.l.bf16 %v2489_v3  ;;  %v2513_v12 = vunpack.c.h.bf16 %v2489_v3 }
 0x58b   :  { %v2504_v55 = vunpack.c.l.bf16 %v2488_v4  ;;  %v2512_v13 = vunpack.c.h.bf16 %v2488_v4  ;;  %v2239_v16 = vpop.f32.mrb[108].mxu0  ;;  %v2506_v15 = vunpack.c.l.bf16 %v2490_v11  ;;  %v2514_v17 = vunpack.c.h.bf16 %v2490_v11  ;;  %v2292_v18 = vpop.f32.mrb[108].mxu1 }
 0x58c   :  { %2535 = vst [vmem:[#allocation2] sm:$0xff] %v2503_v7  ;;  %2543 = vst [vmem:[#allocation2 + $0x40] sm:$0xff] %v2511_v33  ;;  %v2241_v20 = vpop.f32.mrb[109].mxu0  ;;  %v2294_v10 = vpop.f32.mrb[109].mxu1 }
 0x58d   :  { %2537 = vst [vmem:[#allocation2 + $0x10] sm:$0xff] %v2505_v21  ;;  %2545 = vst [vmem:[#allocation2 + $0x50] sm:$0xff] %v2513_v12  ;;  %v2243_v14 = vpop.f32.mrb[110].mxu0  ;;  %v2296_v24 = vpop.f32.mrb[110].mxu1 }
 0x58e   :  { %2536 = vst [vmem:[#allocation2 + $0x8] sm:$0xff] %v2504_v55  ;;  %2544 = vst [vmem:[#allocation2 + $0x48] sm:$0xff] %v2512_v13  ;;  %v2415_v23 = vpack.c.bf16 %v2243_v14, %v2239_v16  ;;  %v2245_v26 = vpop.f32.mrb[111].mxu0  ;;  %v2417_v19 = vpack.c.bf16 %v2296_v24, %v2292_v18  ;;  %v2298_v28 = vpop.f32.mrb[111].mxu1 }
 0x58f   :  { %2538 = vst [vmem:[#allocation2 + $0x18] sm:$0xff] %v2506_v15  ;;  %2546 = vst [vmem:[#allocation2 + $0x58] sm:$0xff] %v2514_v17  ;;  %v2416_v27 = vpack.c.bf16 %v2245_v26, %v2241_v20  ;;  %v2418_v30 = vpack.c.bf16 %v2298_v28, %v2294_v10 }
 0x590   :  { %v2495_v29 = vadd.bf16 %v3411_v22, %v2415_v23  ;;  %v2497_v25 = vadd.bf16 %v3411_v22, %v2417_v19 }
 0x591   :  { %v2496_v32 = vadd.bf16 %v3411_v22, %v2416_v27  ;;  %v2498_v37 = vadd.bf16 %v3411_v22, %v2418_v30 }
 0x592   :  { %v2519_v34 = vunpack.c.l.bf16 %v2495_v29  ;;  %v2527_v35 = vunpack.c.h.bf16 %v2495_v29  ;;  %v2521_v45 = vunpack.c.l.bf16 %v2497_v25  ;;  %v2529_v36 = vunpack.c.h.bf16 %v2497_v25 }
 0x593   :  { %v2520_v38 = vunpack.c.l.bf16 %v2496_v32  ;;  %v2528_v39 = vunpack.c.h.bf16 %v2496_v32  ;;  %v2522_v40 = vunpack.c.l.bf16 %v2498_v37  ;;  %v2530_v41 = vunpack.c.h.bf16 %v2498_v37 }
 0x594   :  { %2551 = vst [vmem:[#allocation2 + $0x80] sm:$0xff] %v2519_v34  ;;  %2559 = vst [vmem:[#allocation2 + $0xc0] sm:$0xff] %v2527_v35 }
 0x595   :  { %2553 = vst [vmem:[#allocation2 + $0x90] sm:$0xff] %v2521_v45  ;;  %2561 = vst [vmem:[#allocation2 + $0xd0] sm:$0xff] %v2529_v36 }
 0x596   :  { %2552 = vst [vmem:[#allocation2 + $0x88] sm:$0xff] %v2520_v38  ;;  %2560 = vst [vmem:[#allocation2 + $0xc8] sm:$0xff] %v2528_v39 }
 0x597   :  { %2554 = vst [vmem:[#allocation2 + $0x98] sm:$0xff] %v2522_v40  ;;  %2562 = vst [vmem:[#allocation2 + $0xd8] sm:$0xff] %v2530_v41 }
 0x5a3   :  { %v2335_v42 = vpop.f32.mrb[112].mxu0  ;;  %v2388_v43 = vpop.f32.mrb[112].mxu1 }
 0x5a4   :  { %v2337_v44 = vpop.f32.mrb[113].mxu0  ;;  %v2390_v46 = vpop.f32.mrb[113].mxu1 }
 0x5a5   :  { %v2339_v47 = vpop.f32.mrb[114].mxu0  ;;  %v2392_v9 = vpop.f32.mrb[114].mxu1 }
 0x5a6   :  { %v2411_v48 = vpack.c.bf16 %v2339_v47, %v2335_v42  ;;  %v2341_v49 = vpop.f32.mrb[115].mxu0  ;;  %v2413_v50 = vpack.c.bf16 %v2392_v9, %v2388_v43  ;;  %v2394_v58 = vpop.f32.mrb[115].mxu1 }
 0x5a7   :  { %v2412_v51 = vpack.c.bf16 %v2341_v49, %v2337_v44  ;;  %v2414_v54 = vpack.c.bf16 %v2394_v58, %v2390_v46 }
 0x5a8   :  { %v2491_v53 = vadd.bf16 %v3403_v59, %v2411_v48  ;;  %v2493_v31 = vadd.bf16 %v3403_v59, %v2413_v50 }
 0x5a9   :  { %v2492_v56 = vadd.bf16 %v3403_v59, %v2412_v51  ;;  %v2494_v60 = vadd.bf16 %v3403_v59, %v2414_v54 }
 0x5aa   :  { %v2507_v57 = vunpack.c.l.bf16 %v2491_v53  ;;  %v2515_v8 = vunpack.c.h.bf16 %v2491_v53  ;;  %v2509_v5 = vunpack.c.l.bf16 %v2493_v31  ;;  %v2517_v61 = vunpack.c.h.bf16 %v2493_v31 }
 0x5ab   :  { %v2508_v62 = vunpack.c.l.bf16 %v2492_v56  ;;  %v2516_v52 = vunpack.c.h.bf16 %v2492_v56  ;;  %v2345_v63 = vpop.f32.mrb[116].mxu0  ;;  %v2510_v0 = vunpack.c.l.bf16 %v2494_v60  ;;  %v2518_v1 = vunpack.c.h.bf16 %v2494_v60  ;;  %v2398_v2 = vpop.f32.mrb[116].mxu1 }
 0x5ac   :  { %2539 = vst [vmem:[#allocation2 + $0x20] sm:$0xff] %v2507_v57  ;;  %2547 = vst [vmem:[#allocation2 + $0x60] sm:$0xff] %v2515_v8  ;;  %v2347_v3 = vpop.f32.mrb[117].mxu0  ;;  %v2400_v4 = vpop.f32.mrb[117].mxu1 }
 0x5ad   :  { %2541 = vst [vmem:[#allocation2 + $0x30] sm:$0xff] %v2509_v5  ;;  %2549 = vst [vmem:[#allocation2 + $0x70] sm:$0xff] %v2517_v61  ;;  %v2349_v6 = vpop.f32.mrb[118].mxu0  ;;  %v2402_v7 = vpop.f32.mrb[118].mxu1 }
 0x5ae   :  { %2540 = vst [vmem:[#allocation2 + $0x28] sm:$0xff] %v2508_v62  ;;  %2548 = vst [vmem:[#allocation2 + $0x68] sm:$0xff] %v2516_v52  ;;  %v2419_v59 = vpack.c.bf16 %v2349_v6, %v2345_v63  ;;  %v2351_v33 = vpop.f32.mrb[119].mxu0  ;;  %v2421_v11 = vpack.c.bf16 %v2402_v7, %v2398_v2  ;;  %v2404_v12 = vpop.f32.mrb[119].mxu1 }
 0x5af   :  { %2542 = vst [vmem:[#allocation2 + $0x38] sm:$0xff] %v2510_v0  ;;  %2550 = vst [vmem:[#allocation2 + $0x78] sm:$0xff] %v2518_v1  ;;  %v2420_v21 = vpack.c.bf16 %v2351_v33, %v2347_v3  ;;  %v2422_v13 = vpack.c.bf16 %v2404_v12, %v2400_v4 }
 0x5b0   :  { %v2499_v55 = vadd.bf16 %v3411_v22, %v2419_v59  ;;  %v2501_v16 = vadd.bf16 %v3411_v22, %v2421_v11 }
 0x5b1   :  { %v2500_v15 = vadd.bf16 %v3411_v22, %v2420_v21  ;;  %v2502_v20 = vadd.bf16 %v3411_v22, %v2422_v13 }
 0x5b2   :  { %v2523_v17 = vunpack.c.l.bf16 %v2499_v55  ;;  %v2531_v18 = vunpack.c.h.bf16 %v2499_v55  ;;  %v2525_v10 = vunpack.c.l.bf16 %v2501_v16  ;;  %v2533_v14 = vunpack.c.h.bf16 %v2501_v16 }
 0x5b3   :  { %v2524_v23 = vunpack.c.l.bf16 %v2500_v15  ;;  %v2532_v24 = vunpack.c.h.bf16 %v2500_v15  ;;  %v2526_v26 = vunpack.c.l.bf16 %v2502_v20  ;;  %v2534_v19 = vunpack.c.h.bf16 %v2502_v20 }
 0x5b4   :  { %2555 = vst [vmem:[#allocation2 + $0xa0] sm:$0xff] %v2523_v17  ;;  %2563 = vst [vmem:[#allocation2 + $0xe0] sm:$0xff] %v2531_v18 }
 0x5b5   :  { %2557 = vst [vmem:[#allocation2 + $0xb0] sm:$0xff] %v2525_v10  ;;  %2565 = vst [vmem:[#allocation2 + $0xf0] sm:$0xff] %v2533_v14 }
 0x5b6   :  { %2556 = vst [vmem:[#allocation2 + $0xa8] sm:$0xff] %v2524_v23  ;;  %2564 = vst [vmem:[#allocation2 + $0xe8] sm:$0xff] %v2532_v24 }
 0x5b7   :  { %2558 = vst [vmem:[#allocation2 + $0xb8] sm:$0xff] %v2526_v26  ;;  %2566 = vst [vmem:[#allocation2 + $0xf8] sm:$0xff] %v2534_v19 }
 0x5b8   :  { %2722 = shalt.err (!%p2719_p4)
}
 0x5b9   :  { %s2723_s24 = scalar_lea.hbm %s3450_s13, 4096 }
 0x5ba   :  { %p2724_p5 = scmp.ne.s32.totalorder %s3450_s13, %s2723_s24  ;;  %p2727_p6 = scmp.lt.u32.totalorder %s2723_s24, %s3450_s13 }
 0x5bc   :  { %p2729_p7 = pnand %p2727_p6, %p2724_p5 }
 0x5be   :  { %2732 = shalt.err (!%p2729_p7)
}
 0x5bf   :  { %s2738_s28 = smov 1024   ;;  %s2739_s0 = smov 64  }
 0x5c0   :  { %2578 = dma.vmem_to_hbm [thread:$0]  %s2573_s1, 4096, %s3450_s13, [#allocation3], %s2738_s28, %s2738_s28, %s2739_s0  }
 0x5c1   :  { %2733 = dma.done.wait [#allocation3], 4096  }
 0x5c2   :  { %2734 = vsyncadd [#allocation3], 4294963200 }
 0x5c3   :  { %2582 = vsyncpa [#allocation3], 1 }

</bundles_post_ra>
